<compile_context>
chip_gen: v6e
topology: v6e:2x2x1
jax: 0.10.0
libtpu: 0.0.40
codegen_flags: <defaults>
</compile_context>

<pallas_src>
import jax
import jax.numpy as jnp
from jax.experimental import pallas as pl
from jax.experimental.pallas import tpu as pltpu

SLOPE = 0.01
LANE = 128


def _round_up(x, m):
    return (x + m - 1) // m * m


def _leaky_relu(h):
    return jnp.where(h >= 0, h, h * SLOPE)


def generator_kernel(x_ref,
                     w1_ref, b1_ref,
                     w2_ref, b2_ref,
                     w3_ref, b3_ref,
                     w4_ref, b4_ref,
                     w5_ref, b5_ref,
                     o_ref):
    # Whole 5-layer MLP for one batch tile; intermediates never leave VMEM.
    def linear(h, w_ref, b_ref):
        # bf16 x bf16 MXU matmul with f32 accumulation, f32 bias add.
        return (jnp.dot(h.astype(jnp.bfloat16), w_ref[...],
                        preferred_element_type=jnp.float32)
                + b_ref[...])

    h = x_ref[...].astype(jnp.float32)
    h = _leaky_relu(linear(h, w1_ref, b1_ref))
    h = _leaky_relu(linear(h, w2_ref, b2_ref))
    h = _leaky_relu(linear(h, w3_ref, b3_ref))
    h = _leaky_relu(linear(h, w4_ref, b4_ref))
    h = linear(h, w5_ref, b5_ref)
    o_ref[...] = h.astype(o_ref.dtype)


def generator_forward(x, params, *, tb=256):
    """x: [B, g_input_dim] f32. params: list of (W[in,out] f32, b[1,out] f32).

    Returns [B, g_output_dim] f32 (bf16 weights / f32 accumulation inside).
    """
    B, d_in = x.shape
    d_out = params[-1][0].shape[1]

    # Batch tile: multiple of 8 sublanes, no larger than the padded batch.
    tb = _round_up(min(tb, _round_up(B, 8)), 8)
    b_pad = _round_up(B, tb)

    # Zero-pad input features to a lane multiple.
    d_in_p = _round_up(d_in, LANE)
    x_p = jnp.zeros((b_pad, d_in_p), jnp.float32).at[:B, :d_in].set(x)

    flat = []
    in_specs = [pl.BlockSpec((tb, d_in_p), lambda i: (i, 0))]
    prev_p = d_in_p
    padded_dims = [d_in_p]
    for w, b in params:
        di, do = w.shape
        di_p, do_p = _round_up(di, LANE), _round_up(do, LANE)
        assert di_p == prev_p, "layer input dim must match previous output dim"
        w_p = (jnp.zeros((di_p, do_p), jnp.bfloat16)
               .at[:di, :do].set(w.astype(jnp.bfloat16)))
        b_p = jnp.zeros((1, do_p), jnp.float32).at[:, :do].set(b)
        flat += [w_p, b_p]
        # Constant index_map -> weights/biases stay resident across the grid.
        in_specs += [pl.BlockSpec((di_p, do_p), lambda i: (0, 0)),
                     pl.BlockSpec((1, do_p), lambda i: (0, 0))]
        prev_p = do_p
        padded_dims.append(do_p)
    d_out_p = prev_p

    # Generous VMEM budget: 2x (resident weights) + double-buffered x/out tiles
    # + a few live intermediate activation tiles at the widest layer.
    weight_bytes = sum(int(a.size) * a.dtype.itemsize for a in flat)
    tile_io_bytes = 4 * tb * (d_in_p + d_out_p)
    act_bytes = 4 * tb * max(padded_dims) * 3
    vmem_limit = int(2 * weight_bytes + 2 * tile_io_bytes + act_bytes) + (4 << 20)
    vmem_limit = max(vmem_limit, 16 << 20)

    out_p = pl.pallas_call(
        generator_kernel,
        out_shape=jax.ShapeDtypeStruct((b_pad, d_out_p), jnp.float32),
        grid=(b_pad // tb,),
        in_specs=in_specs,
        out_specs=pl.BlockSpec((tb, d_out_p), lambda i: (i, 0)),
        compiler_params=pltpu.CompilerParams(
            dimension_semantics=("parallel",),
            vmem_limit_bytes=vmem_limit),
    )(x_p, *flat)

    return out_p[:B, :d_out]


def init_generator_params(key, g_input_dim, g_output_dim):
    """Deterministic init mimicking nn.Linear defaults: U(-1/sqrt(fan_in), ...)."""
    dims_in = [g_input_dim,
               g_input_dim * 2,
               g_input_dim * 4,
               g_input_dim * 8,
               g_input_dim * 16]
    dims_out = [g_input_dim * 2,
                g_input_dim * 4,
                g_input_dim * 8,
                g_input_dim * 16,
                g_output_dim]
    params = []
    for d_in, d_out in zip(dims_in, dims_out):
        key, kw, kb = jax.random.split(key, 3)
        bound = 1.0 / jnp.sqrt(jnp.float32(d_in))
        # Stored as [in, out] (transpose of PyTorch's [out, in]) so the kernel
        # does plain `x @ W + b`.
        w = jax.random.uniform(kw, (d_in, d_out), jnp.float32, -bound, bound)
        b = jax.random.uniform(kb, (1, d_out), jnp.float32, -bound, bound)
        params.append((w, b))
    return params


def generator_reference(x, params):
    """Pure-JAX reference mirroring the kernel numerics (bf16 matmul, f32 acc)."""
    h = x.astype(jnp.float32)
    for i, (w, b) in enumerate(params):
        h = jnp.dot(h.astype(jnp.bfloat16), w.astype(jnp.bfloat16),
                    preferred_element_type=jnp.float32) + b
        if i < len(params) - 1:
            h = jnp.where(h >= 0, h, h * SLOPE)
    return h


if __name__ == "__main__":
    key = jax.random.PRNGKey(0)
    k_x, k_p = jax.random.split(key)

    batch = 200              # non-multiple of the tile to exercise batch padding
    g_input_dim = 32         # small stand-in for the latent dim
    g_output_dim = 64        # small stand-in for `timesteps`

    x = jax.random.normal(k_x, (batch, g_input_dim), jnp.float32)
    params = init_generator_params(k_p, g_input_dim, g_output_dim)

    out = generator_forward(x, params, tb=64)   # 4 grid steps over the batch
    out = jax.block_until_ready(out)

    ref = generator_reference(x, params)
    assert out.shape == (batch, g_output_dim)
    assert jnp.allclose(out, ref, atol=1e-2, rtol=1e-2), "mismatch vs reference"

    print("KERNEL_OK")
</pallas_src>

<mosaic_0001>
module attributes {stable_mosaic.version = 11 : i64} {
  func.func @generator_kernel(%arg0: i32, %arg1: memref<64x128xf32, #tpu.memory_space<vmem>>, %arg2: memref<128x128xbf16, #tpu.memory_space<vmem>>, %arg3: memref<1x128xf32, #tpu.memory_space<vmem>>, %arg4: memref<128x128xbf16, #tpu.memory_space<vmem>>, %arg5: memref<1x128xf32, #tpu.memory_space<vmem>>, %arg6: memref<128x256xbf16, #tpu.memory_space<vmem>>, %arg7: memref<1x256xf32, #tpu.memory_space<vmem>>, %arg8: memref<256x512xbf16, #tpu.memory_space<vmem>>, %arg9: memref<1x512xf32, #tpu.memory_space<vmem>>, %arg10: memref<512x128xbf16, #tpu.memory_space<vmem>>, %arg11: memref<1x128xf32, #tpu.memory_space<vmem>>, %arg12: memref<64x128xf32, #tpu.memory_space<vmem>>) attributes {dimension_semantics = [#tpu.dimension_semantics<parallel>], iteration_bounds = array<i64: 4>, scalar_prefetch = 0 : i64, scratch_operands = 0 : i64, tpu.core_type = #tpu.core_type<tc>, window_params = [{transform_indices = @transform_0, window_bounds = array<i64: 64, 128>}, {pipeline_mode = #tpu.pipeline_mode<synchronous>, transform_indices = @transform_1, window_bounds = array<i64: 128, 128>}, {pipeline_mode = #tpu.pipeline_mode<synchronous>, transform_indices = @transform_2, window_bounds = array<i64: 1, 128>}, {pipeline_mode = #tpu.pipeline_mode<synchronous>, transform_indices = @transform_3, window_bounds = array<i64: 128, 128>}, {pipeline_mode = #tpu.pipeline_mode<synchronous>, transform_indices = @transform_4, window_bounds = array<i64: 1, 128>}, {pipeline_mode = #tpu.pipeline_mode<synchronous>, transform_indices = @transform_5, window_bounds = array<i64: 128, 256>}, {pipeline_mode = #tpu.pipeline_mode<synchronous>, transform_indices = @transform_6, window_bounds = array<i64: 1, 256>}, {pipeline_mode = #tpu.pipeline_mode<synchronous>, transform_indices = @transform_7, window_bounds = array<i64: 256, 512>}, {pipeline_mode = #tpu.pipeline_mode<synchronous>, transform_indices = @transform_8, window_bounds = array<i64: 1, 512>}, {pipeline_mode = #tpu.pipeline_mode<synchronous>, transform_indices = @transform_9, window_bounds = array<i64: 512, 128>}, {pipeline_mode = #tpu.pipeline_mode<synchronous>, transform_indices = @transform_10, window_bounds = array<i64: 1, 128>}, {transform_indices = @transform_11, window_bounds = array<i64: 64, 128>}]} {
    %c0 = arith.constant 0 : index
    %c0_0 = arith.constant 0 : index
    %0 = vector.load %arg1[%c0, %c0_0] : memref<64x128xf32, #tpu.memory_space<vmem>>, vector<64x128xf32>
    %1 = arith.truncf %0 : vector<64x128xf32> to vector<64x128xbf16>
    %c0_1 = arith.constant 0 : index
    %c0_2 = arith.constant 0 : index
    %2 = vector.load %arg2[%c0_1, %c0_2] : memref<128x128xbf16, #tpu.memory_space<vmem>>, vector<128x128xbf16>
    %cst = arith.constant dense<0.000000e+00> : vector<64x128xf32>
    %3 = tpu.matmul %1, %2, %cst {dimension_numbers = #tpu.dot_dimension_numbers<[1], [0], [0], [1], [0, 0, 1, 1], [], []>} : vector<64x128xbf16>, vector<128x128xbf16>, vector<64x128xf32> -> vector<64x128xf32>
    %c0_3 = arith.constant 0 : index
    %c0_4 = arith.constant 0 : index
    %4 = vector.load %arg3[%c0_3, %c0_4] : memref<1x128xf32, #tpu.memory_space<vmem>>, vector<1x128xf32>
    %5 = vector.broadcast %4 : vector<1x128xf32> to vector<64x128xf32>
    %6 = arith.addf %3, %5 : vector<64x128xf32>
    %cst_5 = arith.constant 0.000000e+00 : f32
    %7 = vector.broadcast %cst_5 : f32 to vector<64x128xf32>
    %8 = arith.cmpf oge, %6, %7 : vector<64x128xf32>
    %cst_6 = arith.constant 0.00999999977 : f32
    %9 = vector.broadcast %cst_6 : f32 to vector<64x128xf32>
    %10 = arith.mulf %6, %9 : vector<64x128xf32>
    %11 = arith.select %8, %6, %10 : vector<64x128xi1>, vector<64x128xf32>
    %12 = arith.truncf %11 : vector<64x128xf32> to vector<64x128xbf16>
    %c0_7 = arith.constant 0 : index
    %c0_8 = arith.constant 0 : index
    %13 = vector.load %arg4[%c0_7, %c0_8] : memref<128x128xbf16, #tpu.memory_space<vmem>>, vector<128x128xbf16>
    %cst_9 = arith.constant dense<0.000000e+00> : vector<64x128xf32>
    %14 = tpu.matmul %12, %13, %cst_9 {dimension_numbers = #tpu.dot_dimension_numbers<[1], [0], [0], [1], [0, 0, 1, 1], [], []>} : vector<64x128xbf16>, vector<128x128xbf16>, vector<64x128xf32> -> vector<64x128xf32>
    %c0_10 = arith.constant 0 : index
    %c0_11 = arith.constant 0 : index
    %15 = vector.load %arg5[%c0_10, %c0_11] : memref<1x128xf32, #tpu.memory_space<vmem>>, vector<1x128xf32>
    %16 = vector.broadcast %15 : vector<1x128xf32> to vector<64x128xf32>
    %17 = arith.addf %14, %16 : vector<64x128xf32>
    %cst_12 = arith.constant 0.000000e+00 : f32
    %18 = vector.broadcast %cst_12 : f32 to vector<64x128xf32>
    %19 = arith.cmpf oge, %17, %18 : vector<64x128xf32>
    %cst_13 = arith.constant 0.00999999977 : f32
    %20 = vector.broadcast %cst_13 : f32 to vector<64x128xf32>
    %21 = arith.mulf %17, %20 : vector<64x128xf32>
    %22 = arith.select %19, %17, %21 : vector<64x128xi1>, vector<64x128xf32>
    %23 = arith.truncf %22 : vector<64x128xf32> to vector<64x128xbf16>
    %c0_14 = arith.constant 0 : index
    %c0_15 = arith.constant 0 : index
    %24 = vector.load %arg6[%c0_14, %c0_15] : memref<128x256xbf16, #tpu.memory_space<vmem>>, vector<128x256xbf16>
    %cst_16 = arith.constant dense<0.000000e+00> : vector<64x256xf32>
    %25 = tpu.matmul %23, %24, %cst_16 {dimension_numbers = #tpu.dot_dimension_numbers<[1], [0], [0], [1], [0, 0, 1, 1], [], []>} : vector<64x128xbf16>, vector<128x256xbf16>, vector<64x256xf32> -> vector<64x256xf32>
    %c0_17 = arith.constant 0 : index
    %c0_18 = arith.constant 0 : index
    %26 = vector.load %arg7[%c0_17, %c0_18] : memref<1x256xf32, #tpu.memory_space<vmem>>, vector<1x256xf32>
    %27 = vector.broadcast %26 : vector<1x256xf32> to vector<64x256xf32>
    %28 = arith.addf %25, %27 : vector<64x256xf32>
    %cst_19 = arith.constant 0.000000e+00 : f32
    %29 = vector.broadcast %cst_19 : f32 to vector<64x256xf32>
    %30 = arith.cmpf oge, %28, %29 : vector<64x256xf32>
    %cst_20 = arith.constant 0.00999999977 : f32
    %31 = vector.broadcast %cst_20 : f32 to vector<64x256xf32>
    %32 = arith.mulf %28, %31 : vector<64x256xf32>
    %33 = arith.select %30, %28, %32 : vector<64x256xi1>, vector<64x256xf32>
    %34 = arith.truncf %33 : vector<64x256xf32> to vector<64x256xbf16>
    %c0_21 = arith.constant 0 : index
    %c0_22 = arith.constant 0 : index
    %35 = vector.load %arg8[%c0_21, %c0_22] : memref<256x512xbf16, #tpu.memory_space<vmem>>, vector<256x512xbf16>
    %cst_23 = arith.constant dense<0.000000e+00> : vector<64x512xf32>
    %36 = tpu.matmul %34, %35, %cst_23 {dimension_numbers = #tpu.dot_dimension_numbers<[1], [0], [0], [1], [0, 0, 1, 1], [], []>} : vector<64x256xbf16>, vector<256x512xbf16>, vector<64x512xf32> -> vector<64x512xf32>
    %c0_24 = arith.constant 0 : index
    %c0_25 = arith.constant 0 : index
    %37 = vector.load %arg9[%c0_24, %c0_25] : memref<1x512xf32, #tpu.memory_space<vmem>>, vector<1x512xf32>
    %38 = vector.broadcast %37 : vector<1x512xf32> to vector<64x512xf32>
    %39 = arith.addf %36, %38 : vector<64x512xf32>
    %cst_26 = arith.constant 0.000000e+00 : f32
    %40 = vector.broadcast %cst_26 : f32 to vector<64x512xf32>
    %41 = arith.cmpf oge, %39, %40 : vector<64x512xf32>
    %cst_27 = arith.constant 0.00999999977 : f32
    %42 = vector.broadcast %cst_27 : f32 to vector<64x512xf32>
    %43 = arith.mulf %39, %42 : vector<64x512xf32>
    %44 = arith.select %41, %39, %43 : vector<64x512xi1>, vector<64x512xf32>
    %45 = arith.truncf %44 : vector<64x512xf32> to vector<64x512xbf16>
    %c0_28 = arith.constant 0 : index
    %c0_29 = arith.constant 0 : index
    %46 = vector.load %arg10[%c0_28, %c0_29] : memref<512x128xbf16, #tpu.memory_space<vmem>>, vector<512x128xbf16>
    %cst_30 = arith.constant dense<0.000000e+00> : vector<64x128xf32>
    %47 = tpu.matmul %45, %46, %cst_30 {dimension_numbers = #tpu.dot_dimension_numbers<[1], [0], [0], [1], [0, 0, 1, 1], [], []>} : vector<64x512xbf16>, vector<512x128xbf16>, vector<64x128xf32> -> vector<64x128xf32>
    %c0_31 = arith.constant 0 : index
    %c0_32 = arith.constant 0 : index
    %48 = vector.load %arg11[%c0_31, %c0_32] : memref<1x128xf32, #tpu.memory_space<vmem>>, vector<1x128xf32>
    %49 = vector.broadcast %48 : vector<1x128xf32> to vector<64x128xf32>
    %50 = arith.addf %47, %49 : vector<64x128xf32>
    %c0_33 = arith.constant 0 : index
    %c0_34 = arith.constant 0 : index
    %51 = vector.load %arg12[%c0_33, %c0_34] : memref<64x128xf32, #tpu.memory_space<vmem>>, vector<64x128xf32>
    tpu.vector_store %arg12[%c0_33, %c0_34], %50 {strides = array<i32>} : memref<64x128xf32, #tpu.memory_space<vmem>>, vector<64x128xf32>,
    return
  }
  func.func @transform_0(%arg0: i32) -> (i32, i32) {
    %c0_i32 = arith.constant 0 : i32
    %c0_i32_0 = arith.constant 0 : i32
    return %arg0, %c0_i32 : i32, i32
  }
  func.func @transform_1(%arg0: i32) -> (i32, i32) {
    %c0_i32 = arith.constant 0 : i32
    %c0_i32_0 = arith.constant 0 : i32
    %c0_i32_1 = arith.constant 0 : i32
    return %c0_i32, %c0_i32_0 : i32, i32
  }
  func.func @transform_2(%arg0: i32) -> (i32, i32) {
    %c0_i32 = arith.constant 0 : i32
    %c0_i32_0 = arith.constant 0 : i32
    %c0_i32_1 = arith.constant 0 : i32
    return %c0_i32, %c0_i32_0 : i32, i32
  }
  func.func @transform_3(%arg0: i32) -> (i32, i32) {
    %c0_i32 = arith.constant 0 : i32
    %c0_i32_0 = arith.constant 0 : i32
    %c0_i32_1 = arith.constant 0 : i32
    return %c0_i32, %c0_i32_0 : i32, i32
  }
  func.func @transform_4(%arg0: i32) -> (i32, i32) {
    %c0_i32 = arith.constant 0 : i32
    %c0_i32_0 = arith.constant 0 : i32
    %c0_i32_1 = arith.constant 0 : i32
    return %c0_i32, %c0_i32_0 : i32, i32
  }
  func.func @transform_5(%arg0: i32) -> (i32, i32) {
    %c0_i32 = arith.constant 0 : i32
    %c0_i32_0 = arith.constant 0 : i32
    %c0_i32_1 = arith.constant 0 : i32
    return %c0_i32, %c0_i32_0 : i32, i32
  }
  func.func @transform_6(%arg0: i32) -> (i32, i32) {
    %c0_i32 = arith.constant 0 : i32
    %c0_i32_0 = arith.constant 0 : i32
    %c0_i32_1 = arith.constant 0 : i32
    return %c0_i32, %c0_i32_0 : i32, i32
  }
  func.func @transform_7(%arg0: i32) -> (i32, i32) {
    %c0_i32 = arith.constant 0 : i32
    %c0_i32_0 = arith.constant 0 : i32
    %c0_i32_1 = arith.constant 0 : i32
    return %c0_i32, %c0_i32_0 : i32, i32
  }
  func.func @transform_8(%arg0: i32) -> (i32, i32) {
    %c0_i32 = arith.constant 0 : i32
    %c0_i32_0 = arith.constant 0 : i32
    %c0_i32_1 = arith.constant 0 : i32
    return %c0_i32, %c0_i32_0 : i32, i32
  }
  func.func @transform_9(%arg0: i32) -> (i32, i32) {
    %c0_i32 = arith.constant 0 : i32
    %c0_i32_0 = arith.constant 0 : i32
    %c0_i32_1 = arith.constant 0 : i32
    return %c0_i32, %c0_i32_0 : i32, i32
  }
  func.func @transform_10(%arg0: i32) -> (i32, i32) {
    %c0_i32 = arith.constant 0 : i32
    %c0_i32_0 = arith.constant 0 : i32
    %c0_i32_1 = arith.constant 0 : i32
    return %c0_i32, %c0_i32_0 : i32, i32
  }
  func.func @transform_11(%arg0: i32) -> (i32, i32) {
    %c0_i32 = arith.constant 0 : i32
    %c0_i32_0 = arith.constant 0 : i32
    return %arg0, %c0_i32 : i32, i32
  }
}

</mosaic_0001>

<bundles_post_ra>
// kernel: tpu_custom_call.1
= control target key start
LH: loop header
LB: loop body
LE: loop exit
PB: predicated region body
PF: predicated region fallthrough
CT: control target
= control target key end

     0   :  { %s3694_s0 = inlined_call_operand.hbm [shape: f32[256,128], index: 0, kind: input, shape index: {}]   ;;  %s3695_s1 = inlined_call_operand.hbm [shape: bf16[128,128], index: 1, kind: input, shape index: {}]   ;;  %s3696_s2 = inlined_call_operand.vmem [shape: f32[1,128], index: 2, kind: input, shape index: {}]   ;;  %s3697_s3 = inlined_call_operand.hbm [shape: bf16[128,128], index: 3, kind: input, shape index: {}]   ;;  %s3698_s4 = inlined_call_operand.hbm [shape: f32[1,128], index: 4, kind: input, shape index: {}]   ;;  %s3699_s5 = inlined_call_operand.hbm [shape: bf16[128,256], index: 5, kind: input, shape index: {}]   ;;  %s3700_s6 = inlined_call_operand.vmem [shape: f32[1,256], index: 6, kind: input, shape index: {}]   ;;  %s3701_s7 = inlined_call_operand.hbm [shape: bf16[256,512], index: 7, kind: input, shape index: {}]   ;;  %s3702_s8 = inlined_call_operand.vmem [shape: f32[1,512], index: 8, kind: input, shape index: {}]   ;;  %s3703_s9 = inlined_call_operand.hbm [shape: bf16[512,128], index: 9, kind: input, shape index: {}]   ;;  %s3704_s10 = inlined_call_operand.vmem [shape: f32[1,128], index: 10, kind: input, shape index: {}]   ;;  %s3705_s11 = inlined_call_operand.hbm [shape: f32[256,128], index: 11, kind: output, shape index: {}]  }
   0x1   :  { %3716 = sst [smem:[#allocation20_spill]] %s3695_s1 }
   0x2   :  { %3717 = sst [smem:[#allocation21_spill]] %s3697_s3 }
   0x3   :  { %3718 = sst [smem:[#allocation22_spill]] %s3698_s4 }
   0x4   :  { %3719 = sst [smem:[#allocation23_spill]] %s3699_s5 }
   0x5   :  { %3720 = sst [smem:[#allocation24_spill]] %s3701_s7 }
   0x6   :  { %16 = vsyncpa [#allocation3], 0 }
   0x7   :  { %18 = vsyncpa [#allocation3 + $0x1], 0 }
   0x8   :  { %19 = vsyncpa [#allocation6], 0 }
   0x9   :  { %20 = vsyncpa [#allocation9], 0 }
   0xa   :  { %21 = vsyncpa [#allocation12], 0 }
   0xb   :  { %22 = vsyncpa [#allocation4], 0 }
   0xc   :  { %24 = vsyncpa [#allocation4 + $0x1], 0  ;;  %s3229_s17 = smov 0   ;;  %s3231_s18 = smov 0  }
   0xd   :  { %s3233_s19 = smov 0   ;;  %s3235_s20 = smov 0  }
   0xe LB: > { %s3152_s21 = smov [#allocation5]   ;;  %s3250_s23 = sadd.s32 4294967295, %s3150_s20   ;;  %s3150_s20 = sphi %s3235_s20, %s3751_s20   ;;  %s3146_s19 = sphi %s3233_s19, %s3750_s19   ;;  %s3142_s18 = sphi %s3231_s18, %s3749_s18   ;;  %s3138_s17 = sphi %s3229_s17, %s3748_s17  }
   0xf   : > { %s309_s22 = sshll.u32 %s3152_s21, 4  ;;  %p2280_p0 = scmp.ge.s32.totalorder %s3150_s20, 1  ;;  %s310_s22 = int_to_ptr.vmem [resolvable:$true] %s309_s22 }
  0x10   : > { %p3712_p1 = scmp.eq.s32.totalorder %s3250_s23, 0  ;;  %p297_p2 = scmp.lt.s32.totalorder %s3150_s20, 5 }
  0x11   : > { %s3153_s25 = smov [#allocation8]   ;;  %s3154_s28 = smov [#allocation11]  }
  0x12   : > { %p3255_p3 = pnand %p2280_p0, %p297_p2  ;;  %s339_s26 = sshll.u32 %s3153_s25, 4  ;;  %s340_s26 = int_to_ptr.vmem [resolvable:$true] %s339_s26 }
  0x13   : > { %s365_s29 = sshll.u32 %s3154_s28, 4  ;;  %s2901_s12 = scalar_lea.vmem %s310_s22, 1024  ;;  %s3267_s29 = int_to_ptr.vmem [resolvable:$true] %s365_s29 }
  0x14   : > { %s3721_s24 = scalar_select %p3255_p3, 1, 0 }
  0x15   : > { %p2634_p4 = pneg %p3255_p3  ;;  %p2902_p7 = scmp.ne.s32.totalorder %s310_s22, %s2901_s12 }
  0x16   : > { %p2909_p10 = scmp.lt.s32.totalorder %s310_s22, %s310_s22  ;;  %p2910_p11 = scmp.lt.s32.totalorder %s2901_s12, %s2901_s12 }
  0x17   : > { %p3263_p5 = pnand %p2634_p4, %p3712_p1 }
  0x18   : > { %p2911_p12 = por %p2910_p11, %p2909_p10 }
  0x19   : > { %p3271_p6 = pneg %p3263_p5 }
  0x1b   : > { %p2904_p8 = pnand %p2902_p7, %p3271_p6 }
  0x1d   : > { %p2905_p9 = pneg %p2904_p8 }
  0x1f   : > { %p2912_p13 = pnand %p2911_p12, %p2905_p9 }
  0x21   : > { %2915 = shalt.err (!%p2912_p13)
}
  0x22   : > { %s3706_s13 = smov 64   ;;  %s3708_s14 = smov 4  }
  0x23   : > { %s3724_s1 = sld [smem:[#allocation20_spill]]  ;;  %s2927_s21 = scalar_lea.vmem %s340_s26, 16 }
  0x24   : > { %p2928_p0 = scmp.ne.s32.totalorder %s340_s26, %s2927_s21  ;;  %s2934_s25 = scalar_lea.vmem %s340_s26, 32 }
  0x25   : > { %p2935_p7 = scmp.lt.s32.totalorder %s340_s26, %s340_s26  ;;  %p2936_p8 = scmp.lt.s32.totalorder %s2934_s25, %s2927_s21 }
  0x26   : > { %p2930_p2 = pnand %p2928_p0, %p3271_p6 }
  0x27   : > { %p2937_p9 = por %p2936_p8, %p2935_p7 }
  0x28   : > { %p2931_p4 = pneg %p2930_p2 }
  0x29   : > { %2637 = dma.hbm_to_vmem [thread:$0]  (!%p3263_p5), %s3724_s1, 1024, %s310_s22, [#allocation6], %s3706_s13, %s3706_s13, %s3708_s14  }
  0x2a   : > { %p2938_p10 = pnand %p2937_p9, %p2931_p4 }
  0x2c   : > { %2941 = shalt.err (!%p2938_p10)
}
  0x2d   : > { %s3725_s4 = sld [smem:[#allocation22_spill]]  ;;  %s2953_s22 = scalar_lea.vmem %s3267_s29, 8192 }
  0x2e   : > { %p2954_p11 = scmp.ne.s32.totalorder %s3267_s29, %s2953_s22  ;;  %p2961_p0 = scmp.lt.s32.totalorder %s3267_s29, %s3267_s29 }
  0x2f   : > { %p2962_p2 = scmp.lt.s32.totalorder %s2953_s22, %s2953_s22 }
  0x30   : > { %p2956_p12 = pnand %p2954_p11, %p3271_p6 }
  0x31   : > { %p2963_p4 = por %p2962_p2, %p2961_p0 }
  0x32   : > { %p2957_p13 = pneg %p2956_p12 }
  0x33   : > { %2643 = dma.hbm_to_vmem [thread:$0]  (!%p3263_p5), %s3725_s4, 16, %s340_s26, [#allocation9]  }
  0x34   : > { %p2964_p7 = pnand %p2963_p4, %p2957_p13 }
  0x36   : > { %2967 = shalt.err (!%p2964_p7)
}
  0x37   : > { %s3157_s15 = smov 256   ;;  %s3158_s16 = smov 16  }
  0x38   : > { %s3726_s7 = sld [smem:[#allocation24_spill]]  ;;  %s3159_s26 = smov [#allocation7]  }
  0x39   : > { %s325_s28 = sshll.u32 %s3159_s26, 4  ;;  %s3160_s12 = smov [#allocation10]   ;;  %s326_s28 = int_to_ptr.vmem [resolvable:$true] %s325_s28 }
  0x3a   : > { %s349_s13 = sshll.u32 %s3160_s12, 4  ;;  %s2979_s14 = scalar_lea.vmem %s326_s28, 1024  ;;  %s350_s13 = int_to_ptr.vmem [resolvable:$true] %s349_s13 }
  0x3b   : > { %p2980_p8 = scmp.ne.s32.totalorder %s326_s28, %s2979_s14  ;;  %p2987_p11 = scmp.lt.s32.totalorder %s326_s28, %s326_s28 }
  0x3c   : > { %p2988_p12 = scmp.lt.s32.totalorder %s2979_s14, %s2979_s14 }
  0x3d   : > { %p2982_p9 = pnand %p2980_p8, %p3271_p6 }
  0x3e   : > { %2649 = dma.hbm_to_vmem [thread:$0]  (!%p3263_p5), %s3726_s7, 8192, %s3267_s29, [#allocation12], %s3157_s15, %s3157_s15, %s3158_s16  }
  0x3f   : > { %p2983_p10 = pneg %p2982_p9  ;;  %p2989_p13 = por %p2988_p12, %p2987_p11 }
  0x41   : > { %p2990_p0 = pnand %p2989_p13, %p2983_p10 }
  0x43   : > { %2993 = shalt.err (!%p2990_p0)
}
  0x44   : > { %s3727_s22 = smov 4   ;;  %s3728_s21 = smov 64  }
  0x45   : > { %s3729_s3 = sld [smem:[#allocation21_spill]]  ;;  %s3005_s16 = scalar_lea.vmem %s350_s13, 2048 }
  0x46   : > { %p3006_p2 = scmp.ne.s32.totalorder %s350_s13, %s3005_s16  ;;  %p3013_p8 = scmp.lt.s32.totalorder %s350_s13, %s350_s13 }
  0x47   : > { %p3014_p9 = scmp.lt.s32.totalorder %s3005_s16, %s3005_s16 }
  0x48   : > { %p3008_p4 = pnand %p3006_p2, %p3271_p6 }
  0x49   : > { %p3015_p10 = por %p3014_p9, %p3013_p8 }
  0x4a   : > { %p3009_p7 = pneg %p3008_p4 }
  0x4b   : > { %2640 = dma.hbm_to_vmem [thread:$0]  (!%p3263_p5), %s3729_s3, 1024, %s326_s28, [#allocation6], %s3728_s21, %s3728_s21, %s3727_s22  }
  0x4c   : > { %p3016_p11 = pnand %p3015_p10, %p3009_p7 }
  0x4e   : > { %3019 = shalt.err (!%p3016_p11)
}
  0x4f   : > { %s3710_s14 = smov 128   ;;  %s3711_s25 = smov 8  }
  0x50   : > { %s3730_s5 = sld [smem:[#allocation23_spill]]  ;;  %s3163_s12 = smov [#allocation13]  }
  0x51   : > { %s381_s29 = sshll.u32 %s3163_s12, 4  ;;  %s382_s29 = int_to_ptr.vmem [resolvable:$true] %s381_s29 }
  0x52   : > { %s3031_s15 = scalar_lea.vmem %s382_s29, 4096  ;;  %p3039_p2 = scmp.lt.s32.totalorder %s382_s29, %s382_s29 }
  0x53   : > { %p3032_p12 = scmp.ne.s32.totalorder %s382_s29, %s3031_s15  ;;  %p3040_p4 = scmp.lt.s32.totalorder %s3031_s15, %s3031_s15 }
  0x55   : > { %p3034_p13 = pnand %p3032_p12, %p3271_p6  ;;  %p3041_p7 = por %p3040_p4, %p3039_p2 }
  0x56   : > { %2646 = dma.hbm_to_vmem [thread:$0]  (!%p3263_p5), %s3730_s5, 2048, %s350_s13, [#allocation9], %s3710_s14, %s3710_s14, %s3711_s25  }
  0x57   : > { %p3035_p0 = pneg %p3034_p13 }
  0x59   : > { %p3042_p8 = pnand %p3041_p7, %p3035_p0 }
  0x5b   : > { %3045 = shalt.err (!%p3042_p8)
}
  0x5c   : > { %2652 = dma.hbm_to_vmem [thread:$0]  (!%p3263_p5), %s3703_s9, 4096, %s382_s29, [#allocation12], %s3728_s21, %s3728_s21, %s3727_s22  }
  0x5d   : > { %s2279_s27 = sadd.s32 4294967294, %s3150_s20   ;;  %s3336_s30 = sadd.s32 1, %s3150_s20  }
  0x5e   : > { %s34_s26 = ssub.s32 %s3150_s20, %s3336_s30  ;;  %s37_s28 = sadd.s32 1, %s3146_s19 }
  0x5f   : > { %p35_p6 = scmp.eq.s32.totalorder %s34_s26, 0  ;;  %p44_p9 = scmp.ne.s32.totalorder %s3146_s19, %s3142_s18 }
  0x60   : > { %p45_p10 = scmp.eq.s32.totalorder %s3150_s20, 0  ;;  %p50_p11 = scmp.ne.s32.totalorder %s3142_s18, %s3138_s17 }
  0x61   : > { %s3347_s12 = scalar_select %p35_p6, %s3146_s19, %s37_s28  }
  0x62   : > { %p3349_p12 = por %p45_p10, %p44_p9  ;;  %p3355_p5 = por %p3712_p1, %p50_p11 }
  0x63   : > { %p284_p13 = scmp.eq.s32.totalorder %s3250_s23, 3  ;;  %p290_p0 = scmp.eq.s32.totalorder %s2279_s27, 3 }
  0x64   : > { %s3732_s22 = scalar_select %p3355_p5, 1, 0 }
  0x65   : > { %p2667_p2 = scmp.lt.s32.totalorder %s3150_s20, 4  ;;  %s398_s21 = sand.u32 1, %s3146_s19  }
  0x66   : > { %p3362_p4 = por %p284_p13, %p44_p9  ;;  %p3366_p7 = por %p290_p0, %p50_p11 }
  0x67   : > { %s2288_s13 = sshll.u32 %s398_s21, 6  ;;  %s2436_s26 = sshll.u32 %s3150_s20, 10 }
  0x68   : > { %s3733_s29 = scalar_select %p3362_p4, 1, 0 }
  0x69   : > { %s3734_s16 = scalar_select %p3366_p7, 1, 0 }
  0x6a   : > { %s3374_s25 = scalar_lea.hbm %s3694_s0, %s2436_s26  ;;  %s402_s27 = scalar_lea.vmem [#allocation2], %s2288_s13 }
  0x6b   : > { %s409_s1 = sshll.u32 %s402_s27, 4  ;;  %p3380_p8 = pnand %p2667_p2, %p3349_p12  ;;  %s3376_s1 = int_to_ptr.vmem [resolvable:$true] %s409_s1 }
  0x6c   : > { %s3384_s4 = scalar_lea.sflag [#allocation3], %s398_s21  ;;  %s3046_s5 = scalar_lea.hbm %s3374_s25, 1024 }
  0x6d   : > { %p3047_p6 = scmp.ne.s32.totalorder %s3374_s25, %s3046_s5  ;;  %p3048_p9 = pneg %p3380_p8 }
  0x6e   : > { %s3051_s13 = scalar_lea.hbm %s3694_s0, 4096  ;;  %p3052_p12 = scmp.lt.s32.totalorder %s3374_s25, %s3694_s0 }
  0x6f   : > { %p3049_p10 = pnand %p3048_p9, %p3047_p6  ;;  %p3053_p13 = scmp.lt.s32.totalorder %s3051_s13, %s3046_s5 }
  0x71   : > { %p3050_p11 = pneg %p3049_p10  ;;  %p3054_p0 = por %p3053_p13, %p3052_p12 }
  0x73   : > { %p3055_p2 = pnand %p3054_p0, %p3050_p11 }
  0x75   : > { %3058 = shalt.err (!%p3055_p2)
}
  0x76   : > { %s3059_s15 = scalar_lea.vmem %s3376_s1, 1024  ;;  %s3164_s21 = smov [#allocation2]  }
  0x77   : > { %p3060_p1 = scmp.ne.s32.totalorder %s3376_s1, %s3059_s15  ;;  %s3064_s7 = sshll.u32 %s3164_s21, 4  ;;  %s3065_s7 = int_to_ptr.vmem [resolvable:$false] %s3064_s7 }
  0x78   : > { %s3066_s14 = scalar_lea.vmem %s3065_s7, 2048  ;;  %p3067_p10 = scmp.lt.s32.totalorder %s3376_s1, %s3065_s7 }
  0x79   : > { %p3062_p7 = pnand %p3060_p1, %p3048_p9  ;;  %p3068_p4 = scmp.lt.s32.totalorder %s3066_s14, %s3059_s15 }
  0x7b   : > { %p3063_p6 = pneg %p3062_p7  ;;  %p3069_p5 = por %p3068_p4, %p3067_p10 }
  0x7d   : > { %p3070_p3 = pnand %p3069_p5, %p3063_p6 }
  0x7f   : > { %3073 = shalt.err (!%p3070_p3)
}
  0x80   : > { %s3736_s5 = smov 8   ;;  %s3737_s26 = smov 128  }
  0x81   : > { %2656 = dma.hbm_to_vmem [thread:$0]  (!%p3380_p8), %s3374_s25, 1024, %s3376_s1, %s3384_s4, %s3737_s26, %s3737_s26, %s3736_s5  }
  0x82   : > { %p3738_p1 = scmp.ne.s32.totalorder %s3721_s24, 0 }
  0x83   : > { %s3411_s13 = sand.u32 (!%p3738_p1), 1, %s3142_s18   ;;  %p3739_p3 = scmp.ne.s32.totalorder (!%p3738_p1), %s3732_s22, 0 }
  0x84   : > { %421 = sbr.rel (%p3738_p1) target bundleno = 1265 (0x4f1), region = 64  ;;  %s2292_s7 = sshll.u32 (!%p3738_p1), %s3411_s13, 6 }
  0x85   : > { %s424_s28 = scalar_lea.sflag (!%p3738_p1), [#allocation3], %s3411_s13  ;;  %s3417_s3 = scalar_lea.vmem (!%p3738_p1), [#allocation2], %s2292_s7 }
  0x89   : > { %3117 = dma.done.wait (%p3739_p3), %s424_s28, 1024  }
  0x8a   : > { %3119 = vsyncadd (%p3739_p3), %s424_s28, 4294966272  ;;  %p3740_p5 = scmp.eq.s32.totalorder %s3250_s23, 0 }
  0x8c   : > { %3121 = dma.done.wait (%p3740_p5), [#allocation6], 2048   ;;  %p3741_p4 = pmov %p3740_p5 }
  0x8e   : > { %3123 = vsyncadd (%p3741_p4), [#allocation6], 4294965248  ;;  %p3742_p7 = pmov %p3741_p4 }
  0x8f   : > { %p3743_p8 = pmov %p3741_p4 }
  0x90   : > { %3125 = dma.done.wait (%p3742_p7), [#allocation9], 2064  }
  0x91   : > { %3127 = vsyncadd (%p3743_p8), [#allocation9], 4294965232  ;;  %p3744_p9 = pmov %p3741_p4 }
  0x92   : > { %p3745_p11 = pmov %p3741_p4 }
  0x93   : > { %3129 = dma.done.wait (%p3744_p9), [#allocation12], 12288  }
  0x94   : > { %3131 = vsyncadd (%p3745_p11), [#allocation12], 4294955008  ;;  %v2722_v0 = vld [vmem:[#allocation5 + $0x38] sm:$0xff]   ;;  %v2723_v1 = vld [vmem:[#allocation5 + $0x30] sm:$0xff]   ;;  %s3628_s14 = scalar_lea.vmem [#allocation14], %s2292_s7  ;;  %s2437_s26 = sshll.u32 %s3250_s23, 10 }
  0x95   : > { %2542 = vmatprep.subr.bf16.mxu0 %v2722_v0  ;;  %v2724_v2 = vld [vmem:[#allocation5 + $0x28] sm:$0xff]   ;;  %v2725_v3 = vld [vmem:[#allocation5 + $0x20] sm:$0xff]   ;;  %v2726_v7 = vld [vmem:[#allocation5 + $0x18] sm:$0xff]   ;;  %s2149_s5 = sshll.u32 %s3628_s14, 4  ;;  %s2136_s1 = scalar_lea.sflag [#allocation4], %s3411_s13  ;;  %s3644_s5 = int_to_ptr.vmem [resolvable:$true] %s2149_s5 }
  0x96   : > { %2543 = vmatpush3.bf16.msra.mxu0 %v2722_v0  ;;  %v493_v4 = vld [vmem:[%s3417_s3] sm:$0xff]  ;;  %v494_v5 = vld [vmem:[%s3417_s3 + $0x8] sm:$0xff]  ;;  %v2730_v8 = vld [vmem:[#allocation7 + $0x38] sm:$0xff]   ;;  %s3074_s4 = scalar_lea.vmem %s3644_s5, 1024  ;;  %p3746_p13 = scmp.ne.s32.totalorder %s3733_s29, 0 }
  0x97   : > { %2544 = vmatprep.subr.bf16.mxu0 %v2723_v1  ;;  %v501_v6 = vpack.c.bf16 %v494_v5, %v493_v4  ;;  %v2731_v9 = vld [vmem:[#allocation7 + $0x30] sm:$0xff]   ;;  %2566 = vmatprep.subr.bf16.mxu1 %v2730_v8  ;;  %v2732_v11 = vld [vmem:[#allocation7 + $0x28] sm:$0xff]   ;;  %v2733_v12 = vld [vmem:[#allocation7 + $0x20] sm:$0xff]   ;;  %p3075_p12 = scmp.ne.s32.totalorder %s3644_s5, %s3074_s4  ;;  %s3166_s23 = smov [#allocation14]  }
  0x98   : > { %v2727_v10 = vld [vmem:[#allocation5 + $0x10] sm:$0xff]   ;;  %2567 = vmatpush3.bf16.msra.mxu1 %v2730_v8  ;;  %v2728_v13 = vld [vmem:[#allocation5 + $0x8] sm:$0xff]   ;;  %v2734_v14 = vld [vmem:[#allocation7 + $0x18] sm:$0xff]   ;;  %s3078_s24 = sshll.u32 %s3166_s23, 4  ;;  %s3079_s24 = int_to_ptr.vmem [resolvable:$false] %s3078_s24 }
  0x99   : > { %2558 = vmatprep.mubr.bf16.mxu0 %v501_v6  ;;  %2568 = vmatprep.subr.bf16.mxu1 %v2731_v9  ;;  %v2729_v15 = vld [vmem:[#allocation5] sm:$0xff]   ;;  %v495_v16 = vld [vmem:[%s3417_s3 + $0x10] sm:$0xff]  ;;  %v496_v17 = vld [vmem:[%s3417_s3 + $0x18] sm:$0xff]  ;;  %p3076_p0 = pnand %p3075_p12, %p3746_p13  ;;  %s3080_s25 = scalar_lea.vmem %s3079_s24, 2048 }
  0x9a   : > { %2545 = vmatpush3.bf16.msra.mxu0 %v2723_v1  ;;  %v497_v18 = vld [vmem:[%s3417_s3 + $0x20] sm:$0xff]  ;;  %v498_v19 = vld [vmem:[%s3417_s3 + $0x28] sm:$0xff]  ;;  %v502_v20 = vpack.c.bf16 %v496_v17, %v495_v16  ;;  %v499_v22 = vld [vmem:[%s3417_s3 + $0x30] sm:$0xff]  ;;  %v3165_v17 = vmov 0   ;;  %p3081_p6 = scmp.lt.s32.totalorder %s3644_s5, %s3079_s24  ;;  %p3082_p10 = scmp.lt.s32.totalorder %s3080_s25, %s3074_s4 }
  0x9b   : > { %2546 = vmatprep.subr.bf16.mxu0 %v2724_v2  ;;  %v503_v21 = vpack.c.bf16 %v498_v19, %v497_v18  ;;  %v500_v23 = vld [vmem:[%s3417_s3 + $0x38] sm:$0xff]  ;;  %v2735_v25 = vld [vmem:[#allocation7 + $0x10] sm:$0xff]   ;;  %v2736_v26 = vld [vmem:[#allocation7 + $0x8] sm:$0xff]   ;;  %s3651_s3 = scalar_lea.hbm %s3705_s11, %s2437_s26  ;;  %p3077_p2 = pneg %p3076_p0 }
  0x9c   : > { %2569 = vmatpush3.bf16.msra.mxu1 %v2731_v9  ;;  %v504_v24 = vpack.c.bf16 %v500_v23, %v499_v22  ;;  %v2737_v27 = vld [vmem:[#allocation7] sm:$0xff]   ;;  %v2738_v28 = vld [vmem:[#allocation10 + $0x70] ss:$8 sps:$4 sm:$0xff]   ;;  %p3083_p1 = por %p3082_p10, %p3081_p6 }
  0x9d   : > { %2570 = vmatprep.subr.bf16.mxu1 %v2732_v11  ;;  %v2740_v29 = vld [vmem:[#allocation10 + $0x74] ss:$8 sps:$4 sm:$0xff]   ;;  %v2743_v30 = vld [vmem:[#allocation10 + $0x64] ss:$8 sps:$4 sm:$0xff]   ;;  %v2741_v31 = vld [vmem:[#allocation10 + $0x60] ss:$8 sps:$4 sm:$0xff]  }
  0x9e   : > { %2547 = vmatpush3.bf16.msra.mxu0 %v2724_v2  ;;  %v2746_v32 = vld [vmem:[#allocation10 + $0x54] ss:$8 sps:$4 sm:$0xff]   ;;  %v2744_v33 = vld [vmem:[#allocation10 + $0x50] ss:$8 sps:$4 sm:$0xff]   ;;  %v2749_v34 = vld [vmem:[#allocation10 + $0x44] ss:$8 sps:$4 sm:$0xff]   ;;  %p3084_p3 = pnand %p3083_p1, %p3077_p2 }
  0x9f   : > { %2548 = vmatprep.subr.bf16.mxu0 %v2725_v3  ;;  %v2747_v35 = vld [vmem:[#allocation10 + $0x40] ss:$8 sps:$4 sm:$0xff]   ;;  %v2752_v36 = vld [vmem:[#allocation10 + $0x34] ss:$8 sps:$4 sm:$0xff]   ;;  %v2750_v37 = vld [vmem:[#allocation10 + $0x30] ss:$8 sps:$4 sm:$0xff]  }
  0xa0   : > { %2571 = vmatpush3.bf16.msra.mxu1 %v2732_v11  ;;  %v2300_v39 = vld [vmem:[%s3696_s2] ss:$0 sm:$0xff]  ;;  %v2755_v11 = vld [vmem:[#allocation10 + $0x24] ss:$8 sps:$4 sm:$0xff]   ;;  %v2759_v16 = vld [vmem:[#allocation10] ss:$8 sps:$4 sm:$0xff]  }
  0xa1   : > { %2572 = vmatprep.subr.bf16.mxu1 %v2733_v12  ;;  %v2762_v18 = vld [vmem:[#allocation11 + $0xe0] ss:$16 sps:$4 sm:$0xff]   ;;  %v2764_v19 = vld [vmem:[#allocation11 + $0xe4] ss:$16 sps:$4 sm:$0xff]  }
  0xa2   : > { %2549 = vmatpush3.bf16.msra.mxu0 %v2725_v3  ;;  %v2768_v22 = vld [vmem:[#allocation11 + $0xc0] ss:$16 sps:$4 sm:$0xff]   ;;  %v2776_v23 = vld [vmem:[#allocation11 + $0xa4] ss:$16 sps:$4 sm:$0xff]  }
  0xa3   : > { %2550 = vmatprep.subr.bf16.mxu0 %v2726_v7 }
  0xa4   : > { %2573 = vmatpush3.bf16.msra.mxu1 %v2733_v12  ;;  %v2753_v12 = vld [vmem:[#allocation10 + $0x20] ss:$8 sps:$4 sm:$0xff]  }
  0xa5   : > { %2574 = vmatprep.subr.bf16.mxu1 %v2734_v14 }
  0xa6   : > { %2551 = vmatpush3.bf16.msra.mxu0 %v2726_v7 }
  0xa7   : > { %2552 = vmatprep.subr.bf16.mxu0 %v2727_v10 }
  0xa8   : > { %2575 = vmatpush3.bf16.msra.mxu1 %v2734_v14  ;;  %v2756_v14 = vld [vmem:[#allocation10 + $0x10] ss:$8 sps:$4 sm:$0xff]  }
  0xa9   : > { %2576 = vmatprep.subr.bf16.mxu1 %v2735_v25 }
  0xaa   : > { %2553 = vmatpush3.bf16.msra.mxu0 %v2727_v10 }
  0xab   : > { %2554 = vmatprep.subr.bf16.mxu0 %v2728_v13 }
  0xac   : > { %2577 = vmatpush3.bf16.msra.mxu1 %v2735_v25  ;;  %v2782_v25 = vld [vmem:[#allocation11 + $0x84] ss:$16 sps:$4 sm:$0xff]  }
  0xad   : > { %2578 = vmatprep.subr.bf16.mxu1 %v2736_v26 }
  0xae   : > { %2555 = vmatpush3.bf16.msra.mxu0 %v2728_v13  ;;  %v2758_v13 = vld [vmem:[#allocation10 + $0x14] ss:$8 sps:$4 sm:$0xff]  }
  0xaf   : > { %2556 = vmatprep.subr.bf16.mxu0 %v2729_v15 }
  0xb0   : > { %2579 = vmatpush3.bf16.msra.mxu1 %v2736_v26  ;;  %v2780_v26 = vld [vmem:[#allocation11 + $0x80] ss:$16 sps:$4 sm:$0xff]  }
  0xb1   : > { %2580 = vmatprep.subr.bf16.mxu1 %v2737_v27 }
  0xb2   : > { %2557 = vmatpush3.bf16.msra.mxu0 %v2729_v15  ;;  %v2761_v15 = vld [vmem:[#allocation10 + $0x4] ss:$8 sps:$4 sm:$0xff]  }
  0xb3   : > { %941 = vmatprep.subr.bf16.mxu0 %v2740_v29  ;;  %v2794_v29 = vld [vmem:[#allocation11 + $0x44] ss:$16 sps:$4 sm:$0xff]  }
  0xb4   : > { %2581 = vmatpush3.bf16.msra.mxu1 %v2737_v27  ;;  %v2788_v27 = vld [vmem:[#allocation11 + $0x64] ss:$16 sps:$4 sm:$0xff]  }
  0xb5   : > { %2559 = vmatmul.mubr.bf16.vlgmr.msra.gmra.mxu0 %v502_v20  ;;  %v2767_v20 = vld [vmem:[#allocation11 + $0xec] ss:$16 sps:$4 sm:$0xff]   ;;  %1476 = vmatprep.subr.bf16.mxu1 %v2764_v19 }
  0xb6   : > { %2562 = vmatprep.mubr.bf16.mxu0 %v503_v21  ;;  %942 = vmatpush1.bf16.msra.mxu0 %v2738_v28  ;;  %v2770_v21 = vld [vmem:[#allocation11 + $0xc4] ss:$16 sps:$4 sm:$0xff]   ;;  %v2786_v28 = vld [vmem:[#allocation11 + $0x60] ss:$16 sps:$4 sm:$0xff]  }
  0xb7   : > { %943 = vmatprep.subr.bf16.mxu0 %v2743_v30  ;;  %v2792_v30 = vld [vmem:[#allocation11 + $0x40] ss:$16 sps:$4 sm:$0xff]  }
  0xba   : > { %944 = vmatpush1.bf16.msra.mxu0 %v2741_v31  ;;  %v2800_v31 = vld [vmem:[#allocation11 + $0x24] ss:$16 sps:$4 sm:$0xff]  }
  0xbb   : > { %945 = vmatprep.subr.bf16.mxu0 %v2746_v32  ;;  %v2798_v32 = vld [vmem:[#allocation11 + $0x20] ss:$16 sps:$4 sm:$0xff]  }
  0xbd   : > { %2563 = vmatmul.mubr.bf16.gmra.mxu0 %v504_v24  ;;  %v2774_v24 = vld [vmem:[#allocation11 + $0xa0] ss:$16 sps:$4 sm:$0xff]  }
  0xbe   : > { %946 = vmatpush1.bf16.msra.mxu0 %v2744_v33  ;;  %973 = vmatprep.mubr.bf16.mxu0 %v3165_v17  ;;  %v2806_v33 = vld [vmem:[#allocation11 + $0x4] ss:$16 sps:$4 sm:$0xff]  }
  0xbf   : > { %947 = vmatprep.subr.bf16.mxu0 %v2749_v34  ;;  %v2804_v34 = vld [vmem:[#allocation11] ss:$16 sps:$4 sm:$0xff]  }
  0xc2   : > { %948 = vmatpush1.bf16.msra.mxu0 %v2747_v35  ;;  %v2812_v35 = vld [vmem:[#allocation11 + $0x1e4] ss:$16 sps:$4 sm:$0xff]  }
  0xc3   : > { %949 = vmatprep.subr.bf16.mxu0 %v2752_v36  ;;  %v2810_v36 = vld [vmem:[#allocation11 + $0x1e0] ss:$16 sps:$4 sm:$0xff]  }
  0xc6   : > { %950 = vmatpush1.bf16.msra.mxu0 %v2750_v37  ;;  %v2818_v37 = vld [vmem:[#allocation11 + $0x1c4] ss:$16 sps:$4 sm:$0xff]  }
  0xc7   : > { %951 = vmatprep.subr.bf16.mxu0 %v2755_v11  ;;  %v2785_v11 = vld [vmem:[#allocation11 + $0x8c] ss:$16 sps:$4 sm:$0xff]  }
  0xca   : > { %952 = vmatpush1.bf16.msra.mxu0 %v2753_v12 }
  0xcb   : > { %953 = vmatprep.subr.bf16.mxu0 %v2758_v13 }
  0xce   : > { %954 = vmatpush1.bf16.msra.mxu0 %v2756_v14  ;;  %v2783_v14 = vld [vmem:[#allocation11 + $0x88] ss:$16 sps:$4 sm:$0xff]  }
  0xcf   : > { %955 = vmatprep.subr.bf16.mxu0 %v2761_v15  ;;  %v2791_v15 = vld [vmem:[#allocation11 + $0x6c] ss:$16 sps:$4 sm:$0xff]  }
  0xd2   : > { %956 = vmatpush1.bf16.msra.mxu0 %v2759_v16 }
  0xd3   : > { %1549 = vmatprep.subr.bf16.mxu0 %v2767_v20 }
 0x175   : > { %v2560_v38 = vpop.f32.mrf.mxu0 }
 0x176   : > { %v619_v42 = vadd.f32 %v2560_v38, %v2300_v39  ;;  %v2816_v38 = vld [vmem:[#allocation11 + $0x1c0] ss:$16 sps:$4 sm:$0xff]  }
 0x177   : > { %v610_v40 = vpop.f32.mrf.mxu0 }
 0x178   : > { %v611_v41 = vadd.f32 %v2300_v39, %v610_v40  ;;  %v651_v49 = vmul.f32 0.01, %v619_v42  ;;  %vm643_vm2 = vcmp.ge.f32.partialorder %v619_v42, 0.0  ;;  %v2822_v40 = vld [vmem:[#allocation11 + $0x1a0] ss:$16 sps:$4 sm:$0xff]  }
 0x179   : > { %v2561_v43 = vpop.f32.mrf.mxu0 }
 0x17a   : > { %v622_v44 = vadd.f32 %v2561_v43, %v2300_v39  ;;  %v649_v46 = vmul.f32 0.01, %v611_v41  ;;  %vm641_vm1 = vcmp.ge.f32.partialorder %v611_v41, 0.0  ;;  %v659_v61 = vsel %vm643_vm2, %v619_v42, %v651_v49  ;;  %v2828_v42 = vld [vmem:[#allocation11 + $0x180] ss:$16 sps:$4 sm:$0xff]  }
 0x17b   : > { %v613_v45 = vpop.f32.mrf.mxu0  ;;  %v2836_v43 = vld [vmem:[#allocation11 + $0x164] ss:$16 sps:$4 sm:$0xff]  }
 0x17c   : > { %vm644_vm0 = vcmp.ge.f32.partialorder %v622_v44, 0.0  ;;  %v652_v47 = vmul.f32 0.01, %v622_v44  ;;  %v614_v48 = vadd.f32 %v2300_v39, %v613_v45  ;;  %v657_v56 = vsel %vm641_vm1, %v611_v41, %v649_v46  ;;  %v2830_v41 = vld [vmem:[#allocation11 + $0x184] ss:$16 sps:$4 sm:$0xff]  }
 0x17d   : > { %v2564_v50 = vpop.f32.mrf.mxu0  ;;  %v2309_v46 = vld [vmem:[#allocation8] ss:$0 sm:$0xff] }
 0x17e   : > { %v650_v51 = vmul.f32 0.01, %v614_v48  ;;  %v635_v52 = vadd.f32 %v2564_v50, %v2300_v39  ;;  %vm642_vm3 = vcmp.ge.f32.partialorder %v614_v48, 0.0  ;;  %v660_v54 = vsel %vm644_vm0, %v622_v44, %v652_v47  ;;  %v2834_v44 = vld [vmem:[#allocation11 + $0x160] ss:$16 sps:$4 sm:$0xff]  }
 0x17f   : > { %v626_v53 = vpop.f32.mrf.mxu0  ;;  %v666_v0 = vpack.c.bf16 %v660_v54, %v659_v61 }
 0x180   : > { %v627_v55 = vadd.f32 %v2300_v39, %v626_v53  ;;  %v658_v57 = vsel %vm642_vm3, %v614_v48, %v650_v51  ;;  %v655_v58 = vmul.f32 0.01, %v635_v52  ;;  %vm647_vm4 = vcmp.ge.f32.partialorder %v635_v52, 0.0 }
 0x181   : > { %v2565_v59 = vpop.f32.mrf.mxu0  ;;  %v665_v60 = vpack.c.bf16 %v658_v57, %v657_v56 }
 0x182   : > { %v653_v62 = vmul.f32 0.01, %v627_v55  ;;  %v638_v63 = vadd.f32 %v2565_v59, %v2300_v39  ;;  %vm645_vm5 = vcmp.ge.f32.partialorder %v627_v55, 0.0  ;;  %v663_v4 = vsel %vm647_vm4, %v635_v52, %v655_v58 }
 0x183   : > { %v629_v1 = vpop.f32.mrf.mxu0  ;;  %2582 = vmatprep.mubr.bf16.mxu1 %v665_v60  ;;  %v2765_v60 = vld [vmem:[#allocation11 + $0xe8] ss:$16 sps:$4 sm:$0xff]  }
 0x184   : > { %vm648_vm6 = vcmp.ge.f32.partialorder %v638_v63, 0.0  ;;  %v656_v2 = vmul.f32 0.01, %v638_v63  ;;  %v630_v3 = vadd.f32 %v2300_v39, %v629_v1  ;;  %2583 = vmatmul.mubr.bf16.vlgmr.msra.gmra.mxu1 %v666_v0  ;;  %v661_v6 = vsel %vm645_vm5, %v627_v55, %v653_v62  ;;  %v2824_v39 = vld [vmem:[#allocation11 + $0x1a4] ss:$16 sps:$4 sm:$0xff]  }
 0x185   : > { %1477 = vmatpush1.bf16.msra.mxu1 %v2762_v18 }
 0x186   : > { %vm646_vm7 = vcmp.ge.f32.partialorder %v630_v3, 0.0  ;;  %v654_v5 = vmul.f32 0.01, %v630_v3  ;;  %v664_v7 = vsel %vm648_vm6, %v638_v63, %v656_v2  ;;  %1478 = vmatprep.subr.bf16.mxu1 %v2770_v21  ;;  %v2773_v63 = vld [vmem:[#allocation11 + $0xcc] ss:$16 sps:$4 sm:$0xff]  }
 0x187   : > { %v668_v9 = vpack.c.bf16 %v664_v7, %v663_v4  ;;  %v2779_v4 = vld [vmem:[#allocation11 + $0xac] ss:$16 sps:$4 sm:$0xff]   ;;  %v2789_v21 = vld [vmem:[#allocation11 + $0x68] ss:$16 sps:$4 sm:$0xff]  }
 0x188   : > { %v662_v8 = vsel %vm646_vm7, %v630_v3, %v654_v5  ;;  %v2771_v3 = vld [vmem:[#allocation11 + $0xc8] ss:$16 sps:$4 sm:$0xff]  }
 0x189   : > { %v667_v10 = vpack.c.bf16 %v662_v8, %v661_v6  ;;  %1479 = vmatpush1.bf16.msra.mxu1 %v2768_v22 }
 0x18a   : > { %1480 = vmatprep.subr.bf16.mxu1 %v2776_v23  ;;  %v2797_v23 = vld [vmem:[#allocation11 + $0x4c] ss:$16 sps:$4 sm:$0xff]  }
 0x18b   : > { %2586 = vmatprep.mubr.bf16.mxu1 %v667_v10 }
 0x18c   : > { %2587 = vmatmul.mubr.bf16.gmra.mxu1 %v668_v9  ;;  %v2777_v9 = vld [vmem:[#allocation11 + $0xa8] ss:$16 sps:$4 sm:$0xff]  }
 0x18d   : > { %1481 = vmatpush1.bf16.msra.mxu1 %v2774_v24 }
 0x18e   : > { %1482 = vmatprep.subr.bf16.mxu1 %v2782_v25 }
 0x191   : > { %1483 = vmatpush1.bf16.msra.mxu1 %v2780_v26  ;;  %v2795_v26 = vld [vmem:[#allocation11 + $0x48] ss:$16 sps:$4 sm:$0xff]  }
 0x192   : > { %1484 = vmatprep.subr.bf16.mxu1 %v2788_v27  ;;  %v2803_v27 = vld [vmem:[#allocation11 + $0x2c] ss:$16 sps:$4 sm:$0xff]  }
 0x195   : > { %1485 = vmatpush1.bf16.msra.mxu1 %v2786_v28 }
 0x196   : > { %1486 = vmatprep.subr.bf16.mxu1 %v2794_v29 }
 0x199   : > { %1487 = vmatpush1.bf16.msra.mxu1 %v2792_v30  ;;  %v2801_v30 = vld [vmem:[#allocation11 + $0x28] ss:$16 sps:$4 sm:$0xff]  }
 0x19a   : > { %1488 = vmatprep.subr.bf16.mxu1 %v2800_v31 }
 0x19d   : > { %1489 = vmatpush1.bf16.msra.mxu1 %v2798_v32  ;;  %v2809_v32 = vld [vmem:[#allocation11 + $0xc] ss:$16 sps:$4 sm:$0xff]  }
 0x19e   : > { %1490 = vmatprep.subr.bf16.mxu1 %v2806_v33  ;;  %v2807_v33 = vld [vmem:[#allocation11 + $0x8] ss:$16 sps:$4 sm:$0xff]  }
 0x1a1   : > { %1491 = vmatpush1.bf16.msra.mxu1 %v2804_v34  ;;  %v2815_v34 = vld [vmem:[#allocation11 + $0x1ec] ss:$16 sps:$4 sm:$0xff]  }
 0x1a2   : > { %1492 = vmatprep.subr.bf16.mxu1 %v2812_v35  ;;  %v2813_v35 = vld [vmem:[#allocation11 + $0x1e8] ss:$16 sps:$4 sm:$0xff]  }
 0x1a5   : > { %1493 = vmatpush2.bf16.msra.mxu1 %v2810_v36  ;;  %v2819_v36 = vld [vmem:[#allocation11 + $0x1c8] ss:$16 sps:$4 sm:$0xff]  }
 0x1a6   : > { %1494 = vmatprep.subr.bf16.mxu1 %v2818_v37  ;;  %v2827_v37 = vld [vmem:[#allocation11 + $0x1ac] ss:$16 sps:$4 sm:$0xff]  }
 0x1a9   : > { %1495 = vmatpush2.bf16.msra.mxu1 %v2816_v38  ;;  %v2825_v38 = vld [vmem:[#allocation11 + $0x1a8] ss:$16 sps:$4 sm:$0xff]  }
 0x1aa   : > { %1496 = vmatprep.subr.bf16.mxu1 %v2824_v39  ;;  %v2833_v39 = vld [vmem:[#allocation11 + $0x18c] ss:$16 sps:$4 sm:$0xff]  }
 0x1ad   : > { %1497 = vmatpush2.bf16.msra.mxu1 %v2822_v40  ;;  %v2831_v40 = vld [vmem:[#allocation11 + $0x188] ss:$16 sps:$4 sm:$0xff]  }
 0x1ae   : > { %1498 = vmatprep.subr.bf16.mxu1 %v2830_v41  ;;  %v2839_v41 = vld [vmem:[#allocation11 + $0x16c] ss:$16 sps:$4 sm:$0xff]  }
 0x1b1   : > { %1499 = vmatpush2.bf16.msra.mxu1 %v2828_v42  ;;  %v2837_v42 = vld [vmem:[#allocation11 + $0x168] ss:$16 sps:$4 sm:$0xff]  }
 0x1b2   : > { %1500 = vmatprep.subr.bf16.mxu1 %v2836_v43  ;;  %v2842_v43 = vld [vmem:[#allocation11 + $0x144] ss:$16 sps:$4 sm:$0xff]  }
 0x1b5   : > { %1501 = vmatpush2.bf16.msra.mxu1 %v2834_v44  ;;  %v2845_v44 = vld [vmem:[#allocation11 + $0x14c] ss:$16 sps:$4 sm:$0xff]  }
 0x1b6   : > { %1502 = vmatprep.subr.bf16.mxu1 %v2842_v43 }
 0x244   : > { %v2584_v45 = vpop.f32.mrf.mxu1 }
 0x245   : > { %v783_v57 = vadd.f32 %v2584_v45, %v2309_v46  ;;  %v2840_v45 = vld [vmem:[#allocation11 + $0x140] ss:$16 sps:$4 sm:$0xff]  }
 0x246   : > { %v774_v47 = vpop.f32.mrf.mxu1  ;;  %1503 = vmatpush2.bf16.msra.mxu1 %v2840_v45 }
 0x247   : > { %v775_v48 = vadd.f32 %v2309_v46, %v774_v47  ;;  %v815_v2 = vmul.f32 0.01, %v783_v57  ;;  %vm807_vm11 = vcmp.ge.f32.partialorder %v783_v57, 0.0  ;;  %v2848_v47 = vld [vmem:[#allocation11 + $0x124] ss:$16 sps:$4 sm:$0xff]  }
 0x248   : > { %v2585_v49 = vpop.f32.mrf.mxu1  ;;  %1504 = vmatprep.subr.bf16.mxu1 %v2848_v47 }
 0x249   : > { %v813_v51 = vmul.f32 0.01, %v775_v48  ;;  %vm805_vm8 = vcmp.ge.f32.partialorder %v775_v48, 0.0  ;;  %v786_v54 = vadd.f32 %v2585_v49, %v2309_v46  ;;  %v823_v8 = vsel %vm807_vm11, %v783_v57, %v815_v2  ;;  %v2846_v49 = vld [vmem:[#allocation11 + $0x120] ss:$16 sps:$4 sm:$0xff]  }
 0x24a   : > { %v777_v50 = vpop.f32.mrf.mxu1  ;;  %1505 = vmatpush2.bf16.msra.mxu1 %v2846_v49  ;;  %v851_v57 = vlaneseq  ;;  %v3491_v49 = vld [vmem:[#allocation13 + $0xa8] sm:$0xff]  }
 0x24b   : > { %v778_v52 = vadd.f32 %v2309_v46, %v777_v50  ;;  %v821_v58 = vsel %vm805_vm8, %v775_v48, %v813_v51  ;;  %v816_v0 = vmul.f32 0.01, %v786_v54  ;;  %vm808_vm10 = vcmp.ge.f32.partialorder %v786_v54, 0.0  ;;  %v2851_v48 = vld [vmem:[#allocation11 + $0x12c] ss:$16 sps:$4 sm:$0xff]  }
 0x24c   : > { %v2588_v53 = vpop.f32.mrf.mxu1  ;;  %v2849_v50 = vld [vmem:[#allocation11 + $0x128] ss:$16 sps:$4 sm:$0xff]   ;;  %v2854_v51 = vld [vmem:[#allocation11 + $0x104] ss:$16 sps:$4 sm:$0xff]  }
 0x24d   : > { %vm806_vm9 = vcmp.ge.f32.partialorder %v778_v52, 0.0  ;;  %v814_v55 = vmul.f32 0.01, %v778_v52  ;;  %v824_v6 = vsel %vm808_vm10, %v786_v54, %v816_v0  ;;  %v799_v19 = vadd.f32 %v2588_v53, %v2309_v46  ;;  %v2852_v53 = vld [vmem:[#allocation11 + $0x100] ss:$16 sps:$4 sm:$0xff]   ;;  %1506 = vmatprep.subr.bf16.mxu1 %v2854_v51 }
 0x24e   : > { %v790_v56 = vpop.f32.mrf.mxu1  ;;  %v830_v10 = vpack.c.bf16 %v824_v6, %v823_v8  ;;  %v2855_v54 = vld [vmem:[#allocation11 + $0x108] ss:$16 sps:$4 sm:$0xff]   ;;  %1507 = vmatpush2.bf16.msra.mxu1 %v2852_v53  ;;  %v3495_v53 = vld [vmem:[#allocation13 + $0xe0] sm:$0xff]  }
 0x24f   : > { %v822_v59 = vsel %vm806_vm9, %v778_v52, %v814_v55  ;;  %v791_v7 = vadd.f32 %v2309_v46, %v790_v56  ;;  %v819_v25 = vmul.f32 0.01, %v799_v19  ;;  %vm811_vm15 = vcmp.ge.f32.partialorder %v799_v19, 0.0  ;;  %v2857_v52 = vld [vmem:[#allocation11 + $0x10c] ss:$16 sps:$4 sm:$0xff]  }
 0x250   : > { %v829_v61 = vpack.c.bf16 %v822_v59, %v821_v58  ;;  %v2589_v62 = vpop.f32.mrf.mxu1  ;;  %v2858_v55 = vld [vmem:[#allocation13 + $0x78] sm:$0xff]   ;;  %v3453_v58 = vshrl.u32 %v851_v57, 7 }
 0x251   : > { %v817_v13 = vmul.f32 0.01, %v791_v7  ;;  %vm809_vm13 = vcmp.ge.f32.partialorder %v791_v7, 0.0  ;;  %v802_v16 = vadd.f32 %v2589_v62, %v2309_v46  ;;  %v827_v29 = vsel %vm811_vm15, %v799_v19, %v819_v25  ;;  %v3450_v56 = vld [vmem:[#allocation13 + $0xf8] sm:$0xff]   ;;  %2462 = vmatprep.subr.bf16.mxu1 %v2858_v55 }
 0x252   : > { %v793_v1 = vpop.f32.mrf.mxu1  ;;  %974 = vmatmul.mubr.bf16.vlgmr.msra.gmra.mxu0 %v829_v61  ;;  %v857_v59 = vsub.s32 1, %v3453_v58  ;;  %v849_v61 = vld [vmem:[%s3700_s6] sm:$0x3] }
 0x253   : > { %983 = vmatprep.mubr.bf16.mxu0 %v3165_v17  ;;  %1550 = vmatpush1.bf16.msra.mxu0 %v2765_v60  ;;  %v794_v5 = vadd.f32 %v2309_v46, %v793_v1  ;;  %v825_v20 = vsel %vm809_vm13, %v791_v7, %v817_v13  ;;  %v820_v24 = vmul.f32 0.01, %v802_v16  ;;  %vm812_vm14 = vcmp.ge.f32.partialorder %v802_v16, 0.0  ;;  %v2843_v46 = vld [vmem:[#allocation11 + $0x148] ss:$16 sps:$4 sm:$0xff]  }
 0x254   : > { %1551 = vmatprep.subr.bf16.mxu0 %v2773_v63  ;;  %v853_v60 = vsub.s32 0, %v3453_v58  ;;  %v3462_v62 = vrot.slane %v849_v61, %v857_v59 }
 0x255   : > { %v818_v12 = vmul.f32 0.01, %v794_v5  ;;  %vm810_vm12 = vcmp.ge.f32.partialorder %v794_v5, 0.0  ;;  %v828_v28 = vsel %vm812_vm14, %v802_v16, %v820_v24  ;;  %v3474_v24 = vld [vmem:[#allocation13 + $0xb8] sm:$0xff]  }
 0x256   : > { %v832_v31 = vpack.c.bf16 %v828_v28, %v827_v29  ;;  %v3466_v63 = vrot.slane %v849_v61, %v853_v60  ;;  %v3477_v28 = vld [vmem:[#allocation13 + $0xf0] sm:$0xff]  }
 0x257   : > { %1552 = vmatpush1.bf16.msra.mxu0 %v2771_v3  ;;  %v826_v18 = vsel %vm810_vm12, %v794_v5, %v818_v12 }
 0x258   : > { %1553 = vmatprep.subr.bf16.mxu0 %v2779_v4  ;;  %v831_v22 = vpack.c.bf16 %v826_v18, %v825_v20 }
 0x25a   : > { %984 = vmatmul.mubr.bf16.gmra.mxu0 %v830_v10 }
 0x25b   : > { %993 = vmatprep.mubr.bf16.mxu0 %v3165_v17  ;;  %1554 = vmatpush1.bf16.msra.mxu0 %v2777_v9 }
 0x25c   : > { %1555 = vmatprep.subr.bf16.mxu0 %v2785_v11 }
 0x25f   : > { %1556 = vmatpush1.bf16.msra.mxu0 %v2783_v14 }
 0x260   : > { %1557 = vmatprep.subr.bf16.mxu0 %v2791_v15 }
 0x262   : > { %994 = vmatmul.mubr.bf16.gmra.mxu0 %v831_v22 }
 0x263   : > { %1003 = vmatprep.mubr.bf16.mxu0 %v3165_v17  ;;  %1558 = vmatpush1.bf16.msra.mxu0 %v2789_v21  ;;  %v2821_v17 = vld [vmem:[#allocation11 + $0x1cc] ss:$16 sps:$4 sm:$0xff]  }
 0x264   : > { %1559 = vmatprep.subr.bf16.mxu0 %v2797_v23  ;;  %v2859_v23 = vld [vmem:[#allocation13 + $0x38] sm:$0xff]  }
 0x267   : > { %1560 = vmatpush1.bf16.msra.mxu0 %v2795_v26 }
 0x268   : > { %1561 = vmatprep.subr.bf16.mxu0 %v2803_v27  ;;  %v2862_v27 = vld [vmem:[#allocation13 + $0x70] sm:$0xff]  }
 0x26a   : > { %1004 = vmatmul.mubr.bf16.gmra.mxu0 %v832_v31 }
 0x26b   : > { %1562 = vmatpush1.bf16.msra.mxu0 %v2801_v30 }
 0x26c   : > { %1563 = vmatprep.subr.bf16.mxu0 %v2809_v32 }
 0x26f   : > { %1564 = vmatpush1.bf16.msra.mxu0 %v2807_v33 }
 0x270   : > { %1565 = vmatprep.subr.bf16.mxu0 %v2815_v34 }
 0x273   : > { %1566 = vmatpush2.bf16.msra.mxu0 %v2813_v35  ;;  %v2863_v35 = vld [vmem:[#allocation13 + $0x30] sm:$0xff]  }
 0x274   : > { %1567 = vmatprep.subr.bf16.mxu0 %v2821_v17  ;;  %v3481_v17 = vld [vmem:[#allocation13 + $0xb0] sm:$0xff]  }
 0x277   : > { %1568 = vmatpush2.bf16.msra.mxu0 %v2819_v36 }
 0x278   : > { %1569 = vmatprep.subr.bf16.mxu0 %v2827_v37  ;;  %v2866_v37 = vld [vmem:[#allocation13 + $0x68] sm:$0xff]  }
 0x27b   : > { %1570 = vmatpush2.bf16.msra.mxu0 %v2825_v38  ;;  %v3484_v38 = vld [vmem:[#allocation13 + $0xe8] sm:$0xff]  }
 0x27c   : > { %1571 = vmatprep.subr.bf16.mxu0 %v2833_v39 }
 0x27f   : > { %1572 = vmatpush2.bf16.msra.mxu0 %v2831_v40 }
 0x280   : > { %1573 = vmatprep.subr.bf16.mxu0 %v2839_v41 }
 0x283   : > { %1574 = vmatpush2.bf16.msra.mxu0 %v2837_v42 }
 0x284   : > { %1575 = vmatprep.subr.bf16.mxu0 %v2845_v44 }
 0x287   : > { %1576 = vmatpush2.bf16.msra.mxu0 %v2843_v46 }
 0x288   : > { %1577 = vmatprep.subr.bf16.mxu0 %v2851_v48  ;;  %v2867_v48 = vld [vmem:[#allocation13 + $0x28] sm:$0xff]  }
 0x28b   : > { %1578 = vmatpush2.bf16.msra.mxu0 %v2849_v50 }
 0x28c   : > { %1579 = vmatprep.subr.bf16.mxu0 %v2857_v52  ;;  %v2870_v52 = vld [vmem:[#allocation13 + $0x60] sm:$0xff]  }
 0x28f   : > { %1580 = vmatpush2.bf16.msra.mxu0 %v2855_v54 }
 0x290   : > { %2502 = vmatprep.subr.bf16.mxu0 %v3450_v56 }
 0x312   : > { %v975_v0 = vpop.f32.mrf.mxu0 }
 0x313   : > { %v976_v3 = vadd.f32 %v975_v0, %v3466_v63 }
 0x314   : > { %v977_v1 = vpop.f32.mrf.mxu0 }
 0x315   : > { %v978_v2 = vadd.f32 %v977_v1, %v3462_v62  ;;  %v1030_v10 = vmul.f32 0.01, %v976_v3  ;;  %vm1014_vm2 = vcmp.ge.f32.partialorder %v976_v3, 0.0 }
 0x316   : > { %v979_v4 = vpop.f32.mrf.mxu0 }
 0x317   : > { %v980_v5 = vadd.f32 %v979_v4, %v3466_v63  ;;  %v1031_v7 = vmul.f32 0.01, %v978_v2  ;;  %vm1015_vm1 = vcmp.ge.f32.partialorder %v978_v2, 0.0  ;;  %v1046_v19 = vsel %vm1014_vm2, %v976_v3, %v1030_v10  ;;  %v3499_v3 = vld [vmem:[#allocation13 + $0xa0] sm:$0xff]  }
 0x318   : > { %v981_v6 = vpop.f32.mrf.mxu0 }
 0x319   : > { %vm1016_vm0 = vcmp.ge.f32.partialorder %v980_v5, 0.0  ;;  %v1032_v8 = vmul.f32 0.01, %v980_v5  ;;  %v982_v9 = vadd.f32 %v981_v6, %v3462_v62  ;;  %v1047_v16 = vsel %vm1015_vm1, %v978_v2, %v1031_v7  ;;  %v2871_v2 = vld [vmem:[#allocation13 + $0x20] sm:$0xff]   ;;  %v3502_v6 = vld [vmem:[#allocation13 + $0xd8] sm:$0xff]  }
 0x31a   : > { %v985_v11 = vpop.f32.mrf.mxu0 }
 0x31b   : > { %vm1017_vm3 = vcmp.ge.f32.partialorder %v982_v9, 0.0  ;;  %v1033_v12 = vmul.f32 0.01, %v982_v9  ;;  %v1048_v13 = vsel %vm1016_vm0, %v980_v5, %v1032_v8  ;;  %v986_v20 = vadd.f32 %v985_v11, %v3466_v63  ;;  %v2874_v5 = vld [vmem:[#allocation13 + $0x58] sm:$0xff]  }
 0x31c   : > { %v987_v14 = vpop.f32.mrf.mxu0  ;;  %v1062_v25 = vpack.c.bf16 %v1048_v13, %v1046_v19 }
 0x31d   : > { %v988_v15 = vadd.f32 %v987_v14, %v3462_v62  ;;  %v1049_v18 = vsel %vm1017_vm3, %v982_v9, %v1033_v12  ;;  %v1034_v33 = vmul.f32 0.01, %v986_v20  ;;  %vm1018_vm6 = vcmp.ge.f32.partialorder %v986_v20, 0.0 }
 0x31e   : > { %v989_v21 = vpop.f32.mrf.mxu0  ;;  %v1063_v22 = vpack.c.bf16 %v1049_v18, %v1047_v16  ;;  %v2875_v16 = vld [vmem:[#allocation13 + $0x18] sm:$0xff]  }
 0x31f   : > { %v990_v26 = vadd.f32 %v989_v21, %v3466_v63  ;;  %v1035_v30 = vmul.f32 0.01, %v988_v15  ;;  %vm1019_vm5 = vcmp.ge.f32.partialorder %v988_v15, 0.0  ;;  %v1050_v47 = vsel %vm1018_vm6, %v986_v20, %v1034_v33  ;;  %v3512_v33 = vld [vmem:[#allocation13 + $0x98] sm:$0xff]  }
 0x320   : > { %v991_v29 = vpop.f32.mrf.mxu0  ;;  %1508 = vmatprep.mubr.bf16.mxu1 %v1063_v22  ;;  %1581 = vmatprep.mubr.bf16.mxu0 %v1063_v22 }
 0x321   : > { %vm1020_vm4 = vcmp.ge.f32.partialorder %v990_v26, 0.0  ;;  %v1036_v31 = vmul.f32 0.01, %v990_v26  ;;  %v992_v32 = vadd.f32 %v991_v29, %v3462_v62  ;;  %1509 = vmatmul.mubr.bf16.vlgmr.msra.gmra.mxu1 %v1062_v25  ;;  %1582 = vmatmul.mubr.bf16.vlgmr.msra.gmra.mxu0 %v1062_v25  ;;  %v1051_v42 = vsel %vm1019_vm5, %v988_v15, %v1035_v30 }
 0x322   : > { %v995_v34 = vpop.f32.mrf.mxu0  ;;  %2463 = vmatpush3.bf16.msra.mxu1 %v2859_v23  ;;  %2503 = vmatpush3.bf16.msra.mxu0 %v3474_v24 }
 0x323   : > { %vm1021_vm7 = vcmp.ge.f32.partialorder %v992_v32, 0.0  ;;  %v1037_v36 = vmul.f32 0.01, %v992_v32  ;;  %2464 = vmatprep.subr.bf16.mxu1 %v2862_v27  ;;  %2504 = vmatprep.subr.bf16.mxu0 %v3477_v28  ;;  %v1052_v40 = vsel %vm1020_vm4, %v990_v26, %v1036_v31  ;;  %v996_v44 = vadd.f32 %v995_v34, %v3466_v63  ;;  %v3515_v34 = vld [vmem:[#allocation13 + $0xd0] sm:$0xff]  }
 0x324   : > { %v997_v39 = vpop.f32.mrf.mxu0  ;;  %v1064_v51 = vpack.c.bf16 %v1052_v40, %v1050_v47  ;;  %v2883_v40 = vld [vmem:[#allocation13 + $0x8] sm:$0xff]   ;;  %v1146_v47 = vsub.s32 2, %v3453_v58 }
 0x325   : > { %v998_v41 = vadd.f32 %v997_v39, %v3462_v62  ;;  %v1053_v43 = vsel %vm1021_vm7, %v992_v32, %v1037_v36  ;;  %v1038_v0 = vmul.f32 0.01, %v996_v44  ;;  %vm1022_vm10 = vcmp.ge.f32.partialorder %v996_v44, 0.0  ;;  %v3517_v36 = vld [vmem:[#allocation13 + $0x90] sm:$0xff]   ;;  %v3521_v39 = vld [vmem:[#allocation13 + $0xc8] sm:$0xff]  }
 0x326   : > { %v999_v45 = vpop.f32.mrf.mxu0  ;;  %v1065_v46 = vpack.c.bf16 %v1053_v43, %v1051_v42  ;;  %2465 = vmatpush3.bf16.msra.mxu1 %v2863_v35  ;;  %2505 = vmatpush3.bf16.msra.mxu0 %v3481_v17  ;;  %v2879_v35 = vld [vmem:[#allocation13 + $0x10] sm:$0xff]   ;;  %v2886_v42 = vld [vmem:[#allocation13 + $0x40] sm:$0xff]  }
 0x327   : > { %v1000_v50 = vadd.f32 %v999_v45, %v3466_v63  ;;  %2466 = vmatprep.subr.bf16.mxu1 %v2866_v37  ;;  %2506 = vmatprep.subr.bf16.mxu0 %v3484_v38  ;;  %v1039_v55 = vmul.f32 0.01, %v998_v41  ;;  %vm1023_vm9 = vcmp.ge.f32.partialorder %v998_v41, 0.0  ;;  %v1054_v15 = vsel %vm1022_vm10, %v996_v44, %v1038_v0  ;;  %v2882_v37 = vld [vmem:[#allocation13 + $0x48] sm:$0xff]   ;;  %v3527_v43 = vld [vmem:[#allocation13 + $0xc0] sm:$0xff]  }
 0x328   : > { %v1001_v54 = vpop.f32.mrf.mxu0  ;;  %1518 = vmatprep.mubr.bf16.mxu1 %v1065_v46  ;;  %1591 = vmatprep.mubr.bf16.mxu0 %v1065_v46  ;;  %v2887_v44 = vld [vmem:[#allocation13] sm:$0xff]  }
 0x329   : > { %vm1024_vm8 = vcmp.ge.f32.partialorder %v1000_v50, 0.0  ;;  %v1040_v57 = vmul.f32 0.01, %v1000_v50  ;;  %v1002_v61 = vadd.f32 %v1001_v54, %v3462_v62  ;;  %1519 = vmatmul.mubr.bf16.gmra.mxu1 %v1064_v51  ;;  %1592 = vmatmul.mubr.bf16.gmra.mxu0 %v1064_v51  ;;  %v1055_v10 = vsel %vm1023_vm9, %v998_v41, %v1039_v55  ;;  %v3523_v41 = vld [vmem:[#allocation13 + $0x88] sm:$0xff]   ;;  %v3529_v45 = vld [vmem:[#allocation13 + $0x80] sm:$0xff]  }
 0x32a   : > { %v1005_v1 = vpop.f32.mrf.mxu0  ;;  %2467 = vmatpush3.bf16.msra.mxu1 %v2867_v48  ;;  %2507 = vmatpush3.bf16.msra.mxu0 %v3491_v49  ;;  %v1134_v46 = vld [vmem:[%s3702_s8] sm:$0xf]  ;;  %v1150_v48 = vsub.s32 3, %v3453_v58 }
 0x32b   : > { %vm1025_vm11 = vcmp.ge.f32.partialorder %v1002_v61, 0.0  ;;  %v1041_v4 = vmul.f32 0.01, %v1002_v61  ;;  %2468 = vmatprep.subr.bf16.mxu1 %v2870_v52  ;;  %2508 = vmatprep.subr.bf16.mxu0 %v3495_v53  ;;  %v1056_v8 = vsel %vm1024_vm8, %v1000_v50, %v1040_v57  ;;  %v1006_v12 = vadd.f32 %v1005_v1, %v3466_v63 }
 0x32c   : > { %v1007_v7 = vpop.f32.mrf.mxu0  ;;  %v1066_v19 = vpack.c.bf16 %v1056_v8, %v1054_v15  ;;  %v3541_v50 = vrot.slane %v1134_v46, %v853_v60  ;;  %v3543_v52 = vrot.slane %v1134_v46, %v1146_v47  ;;  %v3547_v55 = vrot.slane %v1134_v46, %v857_v59 }
 0x32d   : > { %v1008_v9 = vadd.f32 %v1007_v7, %v3462_v62  ;;  %v1057_v11 = vsel %vm1025_vm11, %v1002_v61, %v1041_v4  ;;  %v1042_v25 = vmul.f32 0.01, %v1006_v12  ;;  %vm1026_vm14 = vcmp.ge.f32.partialorder %v1006_v12, 0.0 }
 0x32e   : > { %v1009_v13 = vpop.f32.mrf.mxu0  ;;  %v1067_v14 = vpack.c.bf16 %v1057_v11, %v1055_v10  ;;  %2469 = vmatpush3.bf16.msra.mxu1 %v2871_v2  ;;  %2509 = vmatpush3.bf16.msra.mxu0 %v3499_v3 }
 0x32f   : > { %v1010_v18 = vadd.f32 %v1009_v13, %v3466_v63  ;;  %2470 = vmatprep.subr.bf16.mxu1 %v2874_v5  ;;  %2510 = vmatprep.subr.bf16.mxu0 %v3502_v6  ;;  %v1043_v21 = vmul.f32 0.01, %v1008_v9  ;;  %vm1027_vm13 = vcmp.ge.f32.partialorder %v1008_v9, 0.0  ;;  %v1058_v31 = vsel %vm1026_vm14, %v1006_v12, %v1042_v25 }
 0x330   : > { %v1011_v20 = vpop.f32.mrf.mxu0  ;;  %1528 = vmatprep.mubr.bf16.mxu1 %v1067_v14  ;;  %1601 = vmatprep.mubr.bf16.mxu0 %v1067_v14 }
 0x331   : > { %vm1028_vm12 = vcmp.ge.f32.partialorder %v1010_v18, 0.0  ;;  %v1044_v22 = vmul.f32 0.01, %v1010_v18  ;;  %v1012_v23 = vadd.f32 %v1011_v20, %v3462_v62  ;;  %1529 = vmatmul.mubr.bf16.gmra.mxu1 %v1066_v19  ;;  %1602 = vmatmul.mubr.bf16.gmra.mxu0 %v1066_v19  ;;  %v1059_v27 = vsel %vm1027_vm13, %v1008_v9, %v1043_v21  ;;  %v2878_v62 = vld [vmem:[#allocation13 + $0x50] sm:$0xff]  }
 0x332   : > { %2471 = vmatpush3.bf16.msra.mxu1 %v2875_v16  ;;  %2511 = vmatpush3.bf16.msra.mxu0 %v3512_v33 }
 0x333   : > { %vm1029_vm15 = vcmp.ge.f32.partialorder %v1012_v23, 0.0  ;;  %v1045_v63 = vmul.f32 0.01, %v1012_v23  ;;  %v1060_v26 = vsel %vm1028_vm12, %v1010_v18, %v1044_v22  ;;  %2472 = vmatprep.subr.bf16.mxu1 %v2878_v62  ;;  %2512 = vmatprep.subr.bf16.mxu0 %v3515_v34 }
 0x334   : > { %v1068_v32 = vpack.c.bf16 %v1060_v26, %v1058_v31 }
 0x335   : > { %v1061_v29 = vsel %vm1029_vm15, %v1012_v23, %v1045_v63 }
 0x336   : > { %v1069_v30 = vpack.c.bf16 %v1061_v29, %v1059_v27  ;;  %2473 = vmatpush3.bf16.msra.mxu1 %v2879_v35  ;;  %2513 = vmatpush3.bf16.msra.mxu0 %v3517_v36 }
 0x337   : > { %2474 = vmatprep.subr.bf16.mxu1 %v2882_v37  ;;  %2514 = vmatprep.subr.bf16.mxu0 %v3521_v39 }
 0x338   : > { %1538 = vmatprep.mubr.bf16.mxu1 %v1069_v30  ;;  %1611 = vmatprep.mubr.bf16.mxu0 %v1069_v30 }
 0x339   : > { %1539 = vmatmul.mubr.bf16.gmra.mxu1 %v1068_v32  ;;  %1612 = vmatmul.mubr.bf16.gmra.mxu0 %v1068_v32 }
 0x33a   : > { %2475 = vmatpush3.bf16.msra.mxu1 %v2883_v40  ;;  %2515 = vmatpush3.bf16.msra.mxu0 %v3523_v41 }
 0x33b   : > { %2476 = vmatprep.subr.bf16.mxu1 %v2886_v42  ;;  %2516 = vmatprep.subr.bf16.mxu0 %v3527_v43 }
 0x33e   : > { %2477 = vmatpush3.bf16.msra.mxu1 %v2887_v44  ;;  %2517 = vmatpush3.bf16.msra.mxu0 %v3529_v45 }
 0x33f   : > { %2590 = vmatprep.subr.bf16.mxu1 %v3450_v56  ;;  %v3549_v56 = vrot.slane %v1134_v46, %v1150_v48 }
 0x3e1   : > { %v1510_v51 = vpop.f32.mrf.mxu1  ;;  %v1583_v54 = vpop.f32.mrf.mxu0 }
 0x3e2   : > { %v1511_v0 = vadd.f32 %v1510_v51, %v3541_v50  ;;  %v1584_v1 = vadd.f32 %v1583_v54, %v3543_v52 }
 0x3e3   : > { %v1512_v57 = vpop.f32.mrf.mxu1  ;;  %v1585_v61 = vpop.f32.mrf.mxu0 }
 0x3e4   : > { %v1513_v60 = vadd.f32 %v1512_v57, %v3547_v55  ;;  %v1586_v5 = vadd.f32 %v1585_v61, %v3549_v56  ;;  %vm1622_vm0 = vcmp.ge.f32.partialorder %v1511_v0, 0.0  ;;  %v1654_v9 = vmul.f32 0.01, %v1511_v0 }
 0x3e5   : > { %v1514_v2 = vpop.f32.mrf.mxu1  ;;  %v1587_v4 = vpop.f32.mrf.mxu0  ;;  %v1656_v10 = vmul.f32 0.01, %v1584_v1  ;;  %vm1624_vm1 = vcmp.ge.f32.partialorder %v1584_v1, 0.0 }
 0x3e6   : > { %v1515_v7 = vadd.f32 %v1514_v2, %v3541_v50  ;;  %v1588_v58 = vadd.f32 %v1587_v4, %v3543_v52  ;;  %v1655_v16 = vmul.f32 0.01, %v1513_v60  ;;  %v1657_v18 = vmul.f32 0.01, %v1586_v5 }
 0x3e7   : > { %v1516_v59 = vpop.f32.mrf.mxu1  ;;  %v1589_v8 = vpop.f32.mrf.mxu0  ;;  %vm1623_vm3 = vcmp.ge.f32.partialorder %v1513_v60, 0.0  ;;  %vm1625_vm5 = vcmp.ge.f32.partialorder %v1586_v5, 0.0  ;;  %v1686_v29 = vsel %vm1622_vm0, %v1511_v0, %v1654_v9  ;;  %v1688_v30 = vsel %vm1624_vm1, %v1584_v1, %v1656_v10 }
 0x3e8   : > { %v1658_v11 = vmul.f32 0.01, %v1515_v7  ;;  %v1517_v12 = vadd.f32 %v1516_v59, %v3547_v55  ;;  %v1590_v13 = vadd.f32 %v1589_v8, %v3549_v56  ;;  %vm1626_vm2 = vcmp.ge.f32.partialorder %v1515_v7, 0.0 }
 0x3e9   : > { %v1520_v14 = vpop.f32.mrf.mxu1  ;;  %v1593_v15 = vpop.f32.mrf.mxu0  ;;  %v1660_v19 = vmul.f32 0.01, %v1588_v58  ;;  %vm1628_vm6 = vcmp.ge.f32.partialorder %v1588_v58, 0.0  ;;  %v1687_v42 = vsel %vm1623_vm3, %v1513_v60, %v1655_v16  ;;  %v1689_v44 = vsel %vm1625_vm5, %v1586_v5, %v1657_v18 }
 0x3ea   : > { %vm1627_vm4 = vcmp.ge.f32.partialorder %v1517_v12, 0.0  ;;  %v1659_v20 = vmul.f32 0.01, %v1517_v12  ;;  %vm1629_vm7 = vcmp.ge.f32.partialorder %v1590_v13, 0.0  ;;  %v1661_v23 = vmul.f32 0.01, %v1590_v13 }
 0x3eb   : > { %v1522_v21 = vpop.f32.mrf.mxu1  ;;  %v1595_v22 = vpop.f32.mrf.mxu0  ;;  %v1690_v25 = vsel %vm1626_vm2, %v1515_v7, %v1658_v11  ;;  %v1692_v62 = vsel %vm1628_vm6, %v1588_v58, %v1660_v19  ;;  %v1521_v35 = vadd.f32 %v1520_v14, %v3541_v50  ;;  %v1594_v47 = vadd.f32 %v1593_v15, %v3543_v52 }
 0x3ec   : > { %v1523_v63 = vadd.f32 %v1522_v21, %v3547_v55  ;;  %v1691_v31 = vsel %vm1627_vm4, %v1517_v12, %v1659_v20  ;;  %v1693_v32 = vsel %vm1629_vm7, %v1590_v13, %v1661_v23  ;;  %v1718_v46 = vpack.c.bf16 %v1690_v25, %v1686_v29 }
 0x3ed   : > { %v1524_v26 = vpop.f32.mrf.mxu1  ;;  %v1597_v27 = vpop.f32.mrf.mxu0  ;;  %v1596_v51 = vadd.f32 %v1595_v22, %v3549_v56  ;;  %v1719_v61 = vpack.c.bf16 %v1691_v31, %v1687_v42  ;;  %v1721_v0 = vpack.c.bf16 %v1693_v32, %v1689_v44  ;;  %v1720_v4 = vpack.c.bf16 %v1692_v62, %v1688_v30 }
 0x3ee   : > { %v1663_v48 = vmul.f32 0.01, %v1523_v63  ;;  %vm1631_vm8 = vcmp.ge.f32.partialorder %v1523_v63, 0.0  ;;  %v1525_v60 = vadd.f32 %v1524_v26, %v3541_v50  ;;  %v1598_v5 = vadd.f32 %v1597_v27, %v3543_v52 }
 0x3ef   : > { %v1526_v37 = vpop.f32.mrf.mxu1  ;;  %v1599_v40 = vpop.f32.mrf.mxu0  ;;  %2029 = vmatprep.mubr.bf16.mxu1 %v1719_v61  ;;  %2094 = vmatprep.mubr.bf16.mxu0 %v1721_v0  ;;  %v1665_v9 = vmul.f32 0.01, %v1596_v51  ;;  %vm1633_vm11 = vcmp.ge.f32.partialorder %v1596_v51, 0.0  ;;  %v1662_v19 = vmul.f32 0.01, %v1521_v35  ;;  %vm1630_vm14 = vcmp.ge.f32.partialorder %v1521_v35, 0.0 }
 0x3f0   : > { %v1527_v54 = vadd.f32 %v1526_v37, %v3547_v55  ;;  %v1600_v57 = vadd.f32 %v1599_v40, %v3549_v56  ;;  %2030 = vmatmul.mubr.bf16.vlgmr.msra.gmra.mxu1 %v1718_v46  ;;  %2095 = vmatmul.mubr.bf16.vlgmr.msra.gmra.mxu0 %v1720_v4  ;;  %v1695_v12 = vsel %vm1631_vm8, %v1523_v63, %v1663_v48  ;;  %v1666_v14 = vmul.f32 0.01, %v1525_v60 }
 0x3f1   : > { %v1530_v1 = vpop.f32.mrf.mxu1  ;;  %v3569_v2 = vpop.f32.mrf.mxu0  ;;  %2598 = vmatpush3.bf16.msra.mxu1 %v3474_v24  ;;  %v1668_v15 = vmul.f32 0.01, %v1598_v5  ;;  %v1664_v20 = vmul.f32 0.01, %v1594_v47  ;;  %vm1634_vm12 = vcmp.ge.f32.partialorder %v1525_v60, 0.0  ;;  %vm1636_vm13 = vcmp.ge.f32.partialorder %v1598_v5, 0.0 }
 0x3f2   : > { %vm1635_vm9 = vcmp.ge.f32.partialorder %v1527_v54, 0.0  ;;  %v1667_v7 = vmul.f32 0.01, %v1527_v54  ;;  %vm1637_vm10 = vcmp.ge.f32.partialorder %v1600_v57, 0.0  ;;  %v1669_v58 = vmul.f32 0.01, %v1600_v57  ;;  %2591 = vmatprep.subr.bf16.mxu1 %v3477_v28 }
 0x3f3   : > { %v1532_v59 = vpop.f32.mrf.mxu1  ;;  %v3573_v8 = vpop.f32.mrf.mxu0  ;;  %vm1632_vm15 = vcmp.ge.f32.partialorder %v1594_v47, 0.0  ;;  %v1697_v22 = vsel %vm1633_vm11, %v1596_v51, %v1665_v9  ;;  %v1698_v26 = vsel %vm1634_vm12, %v1525_v60, %v1666_v14  ;;  %v1700_v27 = vsel %vm1636_vm13, %v1598_v5, %v1668_v15 }
 0x3f4   : > { %v1699_v13 = vsel %vm1635_vm9, %v1527_v54, %v1667_v7  ;;  %v1701_v18 = vsel %vm1637_vm10, %v1600_v57, %v1669_v58  ;;  %v1533_v29 = vadd.f32 %v1532_v59, %v3547_v55  ;;  %v1694_v30 = vsel %vm1630_vm14, %v1521_v35, %v1662_v19 }
 0x3f5   : > { %v1534_v10 = vpop.f32.mrf.mxu1  ;;  %v3576_v11 = vpop.f32.mrf.mxu0  ;;  %v1723_v16 = vpack.c.bf16 %v1699_v13, %v1695_v12  ;;  %2599 = vmatpush3.bf16.msra.mxu1 %v3481_v17  ;;  %v1725_v23 = vpack.c.bf16 %v1701_v18, %v1697_v22  ;;  %v1696_v31 = vsel %vm1632_vm15, %v1594_v47, %v1664_v20  ;;  %v1531_v62 = vadd.f32 %v1530_v1, %v3541_v50 }
 0x3f6   : > { %v1535_v28 = vadd.f32 %v1534_v10, %v3541_v50  ;;  %2592 = vmatprep.subr.bf16.mxu1 %v3484_v38  ;;  %v1722_v37 = vpack.c.bf16 %v1698_v26, %v1694_v30  ;;  %v1724_v17 = vpack.c.bf16 %v1700_v27, %v1696_v31  ;;  %v1671_v48 = vmul.f32 0.01, %v1533_v29 }
 0x3f7   : > { %v1536_v21 = vpop.f32.mrf.mxu1  ;;  %v1609_v24 = vpop.f32.mrf.mxu0  ;;  %2037 = vmatprep.mubr.bf16.mxu1 %v1723_v16  ;;  %2102 = vmatprep.mubr.bf16.mxu0 %v1725_v23  ;;  %v1670_v47 = vmul.f32 0.01, %v1531_v62  ;;  %vm1639_vm2 = vcmp.ge.f32.partialorder %v1533_v29, 0.0  ;;  %vm1638_vm3 = vcmp.ge.f32.partialorder %v1531_v62, 0.0  ;;  %v1604_v16 = vadd.f32 %v3569_v2, %v3543_v52 }
 0x3f8   : > { %v1537_v63 = vadd.f32 %v1536_v21, %v3547_v55  ;;  %v1674_v38 = vmul.f32 0.01, %v1535_v28  ;;  %2038 = vmatmul.mubr.bf16.gmra.mxu1 %v1722_v37  ;;  %2103 = vmatmul.mubr.bf16.gmra.mxu0 %v1724_v17  ;;  %vm1642_vm0 = vcmp.ge.f32.partialorder %v1535_v28, 0.0  ;;  %v1610_v1 = vadd.f32 %v1609_v24, %v3549_v56 }
 0x3f9   : > { %v1540_v25 = vpop.f32.mrf.mxu1  ;;  %v3589_v40 = vpop.f32.mrf.mxu0  ;;  %2600 = vmatpush3.bf16.msra.mxu1 %v3491_v49  ;;  %v1703_v4 = vsel %vm1639_vm2, %v1533_v29, %v1671_v48  ;;  %vm1640_vm12 = vcmp.ge.f32.partialorder %v1604_v16, 0.0 }
 0x3fa   : > { %v1675_v46 = vmul.f32 0.01, %v1537_v63  ;;  %vm1643_vm1 = vcmp.ge.f32.partialorder %v1537_v63, 0.0  ;;  %2593 = vmatprep.subr.bf16.mxu1 %v3495_v53  ;;  %v1706_v0 = vsel %vm1642_vm0, %v1535_v28, %v1674_v38  ;;  %v1541_v60 = vadd.f32 %v1540_v25, %v3541_v50 }
 0x3fb   : > { %v1542_v32 = vpop.f32.mrf.mxu1  ;;  %v1615_v51 = vpop.f32.mrf.mxu0  ;;  %v1677_v12 = vmul.f32 0.01, %v1610_v1  ;;  %vm1645_vm7 = vcmp.ge.f32.partialorder %v1610_v1, 0.0  ;;  %v1614_v25 = vadd.f32 %v3589_v40, %v3543_v52 }
 0x3fc   : > { %v1543_v42 = vadd.f32 %v1542_v32, %v3547_v55  ;;  %v1707_v61 = vsel %vm1643_vm1, %v1537_v63, %v1675_v46  ;;  %vm1646_vm8 = vcmp.ge.f32.partialorder %v1541_v60, 0.0  ;;  %v1616_v19 = vadd.f32 %v1615_v51, %v3549_v56 }
 0x3fd   : > { %v1544_v44 = vpop.f32.mrf.mxu1  ;;  %2601 = vmatpush3.bf16.msra.mxu1 %v3499_v3  ;;  %v1617_v5 = vpop.f32.mrf.mxu0  ;;  %v1727_v7 = vpack.c.bf16 %v1707_v61, %v1703_v4  ;;  %v1702_v3 = vsel %vm1638_vm3, %v1531_v62, %v1670_v47  ;;  %v1709_v15 = vsel %vm1645_vm7, %v1610_v1, %v1677_v12  ;;  %v1680_v27 = vmul.f32 0.01, %v1614_v25 }
 0x3fe   : > { %v1679_v54 = vmul.f32 0.01, %v1543_v42  ;;  %vm1647_vm4 = vcmp.ge.f32.partialorder %v1543_v42, 0.0  ;;  %v1545_v57 = vadd.f32 %v1544_v44, %v3541_v50  ;;  %2594 = vmatprep.subr.bf16.mxu1 %v3502_v6  ;;  %v1726_v58 = vpack.c.bf16 %v1706_v0, %v1702_v3 }
 0x3ff   : > { %v1546_v35 = vpop.f32.mrf.mxu1  ;;  %2045 = vmatprep.mubr.bf16.mxu1 %v1727_v7  ;;  %v1678_v50 = vmul.f32 0.01, %v1541_v60  ;;  %v1619_v13 = vpop.f32.mrf.mxu0  ;;  %v1681_v22 = vmul.f32 0.01, %v1616_v19  ;;  %vm1649_vm13 = vcmp.ge.f32.partialorder %v1616_v19, 0.0  ;;  %vm1648_vm15 = vcmp.ge.f32.partialorder %v1614_v25, 0.0 }
 0x400   : > { %v1547_v49 = vadd.f32 %v1546_v35, %v3547_v55  ;;  %v1606_v55 = vadd.f32 %v3573_v8, %v3549_v56  ;;  %v1711_v6 = vsel %vm1647_vm4, %v1543_v42, %v1679_v54  ;;  %v1682_v9 = vmul.f32 0.01, %v1545_v57  ;;  %2046 = vmatmul.mubr.bf16.gmra.mxu1 %v1726_v58 }
 0x401   : > { %2602 = vmatpush3.bf16.msra.mxu1 %v3512_v33  ;;  %vm1650_vm6 = vcmp.ge.f32.partialorder %v1545_v57, 0.0  ;;  %v1608_v33 = vadd.f32 %v3576_v11, %v3543_v52  ;;  %v1710_v18 = vsel %vm1646_vm8, %v1541_v60, %v1678_v50  ;;  %v1672_v11 = vmul.f32 0.01, %v1604_v16 }
 0x402   : > { %vm1651_vm5 = vcmp.ge.f32.partialorder %v1547_v49, 0.0  ;;  %v1683_v53 = vmul.f32 0.01, %v1547_v49  ;;  %2595 = vmatprep.subr.bf16.mxu1 %v3515_v34  ;;  %v1673_v14 = vmul.f32 0.01, %v1606_v55  ;;  %vm1641_vm9 = vcmp.ge.f32.partialorder %v1606_v55, 0.0 }
 0x403   : > { %v1714_v8 = vsel %vm1650_vm6, %v1545_v57, %v1682_v9  ;;  %v1620_v34 = vadd.f32 %v1619_v13, %v3549_v56  ;;  %v1676_v21 = vmul.f32 0.01, %v1608_v33  ;;  %vm1644_vm10 = vcmp.ge.f32.partialorder %v1608_v33, 0.0 }
 0x404   : > { %v1715_v59 = vsel %vm1651_vm5, %v1547_v49, %v1683_v53  ;;  %v1730_v20 = vpack.c.bf16 %v1714_v8, %v1710_v18  ;;  %v1618_v56 = vadd.f32 %v1617_v5, %v3543_v52  ;;  %v1704_v23 = vsel %vm1640_vm12, %v1604_v16, %v1672_v11  ;;  %v3623_v52 = vld [vmem:[%s3704_s10] ss:$0 sm:$0xff] }
 0x405   : > { %v1731_v10 = vpack.c.bf16 %v1715_v59, %v1711_v6  ;;  %2603 = vmatpush3.bf16.msra.mxu1 %v3517_v36  ;;  %v1705_v36 = vsel %vm1641_vm9, %v1606_v55, %v1673_v14  ;;  %vm1653_vm11 = vcmp.ge.f32.partialorder %v1620_v34, 0.0  ;;  %v1708_v2 = vsel %vm1644_vm10, %v1608_v33, %v1676_v21 }
 0x406   : > { %2596 = vmatprep.subr.bf16.mxu1 %v3521_v39  ;;  %v1729_v24 = vpack.c.bf16 %v1709_v15, %v1705_v36  ;;  %v1685_v39 = vmul.f32 0.01, %v1620_v34  ;;  %v1713_v28 = vsel %vm1649_vm13, %v1616_v19, %v1681_v22  ;;  %v1684_v63 = vmul.f32 0.01, %v1618_v56 }
 0x407   : > { %2053 = vmatprep.mubr.bf16.mxu1 %v1731_v10  ;;  %vm1652_vm14 = vcmp.ge.f32.partialorder %v1618_v56, 0.0 }
 0x408   : > { %2054 = vmatmul.mubr.bf16.gmra.mxu1 %v1730_v20  ;;  %v1716_v29 = vsel %vm1652_vm14, %v1618_v56, %v1684_v63 }
 0x409   : > { %2604 = vmatpush3.bf16.msra.mxu1 %v3523_v41  ;;  %2110 = vmatprep.mubr.bf16.mxu1 %v1729_v24  ;;  %v1717_v41 = vsel %vm1653_vm11, %v1620_v34, %v1685_v39 }
 0x40a   : > { %2597 = vmatprep.subr.bf16.mxu1 %v3527_v43  ;;  %v1728_v43 = vpack.c.bf16 %v1708_v2, %v1704_v23  ;;  %v1733_v26 = vpack.c.bf16 %v1717_v41, %v1713_v28 }
 0x40d   : > { %2605 = vmatpush3.bf16.msra.mxu1 %v3529_v45  ;;  %v1712_v45 = vsel %vm1648_vm15, %v1614_v25, %v1680_v27 }
 0x40e   : > { %v1732_v30 = vpack.c.bf16 %v1716_v29, %v1712_v45 }
 0x410   : > { %2111 = vmatmul.mubr.bf16.vlgmr.msra.gmra.mxu1 %v1728_v43 }
 0x411   : > { %2118 = vmatprep.mubr.bf16.mxu1 %v1733_v26 }
 0x418   : > { %2119 = vmatmul.mubr.bf16.gmra.mxu1 %v1732_v30 }
 0x4b0   : > { %v2478_v31 = vpop.f32.mrf.mxu1  ;;  %v2518_v32 = vpop.f32.mrf.mxu0 }
 0x4b2   : > { %v2479_v62 = vpop.f32.mrf.mxu1  ;;  %v2519_v37 = vpop.f32.mrf.mxu0 }
 0x4b3   : > { %v2480_v17 = vadd.f32 %v2479_v62, %v2478_v31  ;;  %v2520_v38 = vadd.f32 %v2519_v37, %v2518_v32 }
 0x4b4   : > { %v2481_v40 = vpop.f32.mrf.mxu1  ;;  %v2521_v42 = vpop.f32.mrf.mxu0 }
 0x4b5   : > { %v2032_v44 = vadd.f32 %v2480_v17, %v3623_v52 }
 0x4b6   : > { %v2482_v46 = vpop.f32.mrf.mxu1  ;;  %v2522_v48 = vpop.f32.mrf.mxu0 }
 0x4b7   : > { %v2097_v35 = vadd.f32 %v2520_v38, %v2032_v44  ;;  %v2483_v47 = vadd.f32 %v2482_v46, %v2481_v40  ;;  %v2523_v54 = vadd.f32 %v2522_v48, %v2521_v42 }
 0x4b8   : > { %v2484_v49 = vpop.f32.mrf.mxu1  ;;  %v2524_v57 = vpop.f32.mrf.mxu0 }
 0x4b9   : > { %2127 = vst [vmem:[%s3628_s14] sm:$0xff] %v2097_v35  ;;  %v2035_v51 = vadd.f32 %v2483_v47, %v3623_v52 }
 0x4ba   : > { %v2485_v0 = vpop.f32.mrf.mxu1  ;;  %v2525_v1 = vpop.f32.mrf.mxu0 }
 0x4bb   : > { %v2100_v61 = vadd.f32 %v2523_v54, %v2035_v51  ;;  %v2486_v53 = vadd.f32 %v2485_v0, %v2484_v49  ;;  %v2526_v7 = vadd.f32 %v2525_v1, %v2524_v57 }
 0x4bc   : > { %v2487_v4 = vpop.f32.mrf.mxu1  ;;  %v2527_v60 = vpop.f32.mrf.mxu0 }
 0x4bd   : > { %2128 = vst [vmem:[%s3628_s14 + $0x8] sm:$0xff] %v2100_v61  ;;  %v2040_v5 = vadd.f32 %v2486_v53, %v3623_v52 }
 0x4be   : > { %v2488_v3 = vpop.f32.mrf.mxu1  ;;  %v2528_v55 = vpop.f32.mrf.mxu0 }
 0x4bf   : > { %v2105_v58 = vadd.f32 %v2526_v7, %v2040_v5  ;;  %v2489_v6 = vadd.f32 %v2488_v3, %v2487_v4  ;;  %v2529_v9 = vadd.f32 %v2528_v55, %v2527_v60 }
 0x4c0   : > { %v2490_v10 = vpop.f32.mrf.mxu1 }
 0x4c1   : > { %2129 = vst [vmem:[%s3628_s14 + $0x10] sm:$0xff] %v2105_v58  ;;  %v2043_v59 = vadd.f32 %v2489_v6, %v3623_v52 }
 0x4c2   : > { %v2491_v50 = vpop.f32.mrf.mxu1 }
 0x4c3   : > { %v2108_v12 = vadd.f32 %v2529_v9, %v2043_v59  ;;  %v2492_v16 = vadd.f32 %v2491_v50, %v2490_v10 }
 0x4c4   : > { %v2493_v13 = vpop.f32.mrf.mxu1 }
 0x4c5   : > { %2130 = vst [vmem:[%s3628_s14 + $0x18] sm:$0xff] %v2108_v12  ;;  %v2048_v20 = vadd.f32 %v2492_v16, %v3623_v52 }
 0x4c6   : > { %v2494_v14 = vpop.f32.mrf.mxu1 }
 0x4c7   : > { %v2495_v36 = vadd.f32 %v2494_v14, %v2493_v13 }
 0x4c8   : > { %v2496_v33 = vpop.f32.mrf.mxu1 }
 0x4c9   : > { %v2051_v22 = vadd.f32 %v2495_v36, %v3623_v52 }
 0x4ca   : > { %v2497_v8 = vpop.f32.mrf.mxu1 }
 0x4cb   : > { %v2498_v2 = vadd.f32 %v2497_v8, %v2496_v33 }
 0x4cc   : > { %v2499_v34 = vpop.f32.mrf.mxu1 }
 0x4cd   : > { %v2056_v43 = vadd.f32 %v2498_v2, %v3623_v52 }
 0x4ce   : > { %v2500_v15 = vpop.f32.mrf.mxu1 }
 0x4cf   : > { %v2501_v28 = vadd.f32 %v2500_v15, %v2499_v34 }
 0x4d0   : > { %v2530_v18 = vpop.f32.mrf.mxu1 }
 0x4d1   : > { %v2059_v45 = vadd.f32 %v2501_v28, %v3623_v52 }
 0x4d2   : > { %v2531_v19 = vpop.f32.mrf.mxu1 }
 0x4d3   : > { %v2532_v21 = vadd.f32 %v2531_v19, %v2530_v18 }
 0x4d4   : > { %v2533_v24 = vpop.f32.mrf.mxu1 }
 0x4d5   : > { %v2113_v39 = vadd.f32 %v2532_v21, %v2048_v20 }
 0x4d6   : > { %v2534_v11 = vpop.f32.mrf.mxu1 }
 0x4d7   : > { %2131 = vst [vmem:[%s3628_s14 + $0x20] sm:$0xff] %v2113_v39  ;;  %v2535_v56 = vadd.f32 %v2534_v11, %v2533_v24 }
 0x4d8   : > { %v2536_v41 = vpop.f32.mrf.mxu1 }
 0x4d9   : > { %v2116_v23 = vadd.f32 %v2535_v56, %v2051_v22 }
 0x4da   : > { %v2537_v25 = vpop.f32.mrf.mxu1 }
 0x4db   : > { %2132 = vst [vmem:[%s3628_s14 + $0x28] sm:$0xff] %v2116_v23  ;;  %v2538_v63 = vadd.f32 %v2537_v25, %v2536_v41 }
 0x4dc   : > { %v2539_v26 = vpop.f32.mrf.mxu1 }
 0x4dd   : > { %v2121_v27 = vadd.f32 %v2538_v63, %v2056_v43 }
 0x4de   : > { %v2540_v29 = vpop.f32.mrf.mxu1 }
 0x4df   : > { %2133 = vst [vmem:[%s3628_s14 + $0x30] sm:$0xff] %v2121_v27  ;;  %v2541_v30 = vadd.f32 %v2540_v29, %v2539_v26 }
 0x4e1   : > { %v2124_v31 = vadd.f32 %v2541_v30, %v2059_v45 }
 0x4e3   : > { %2134 = vst [vmem:[%s3628_s14 + $0x38] sm:$0xff] %v2124_v31 }
 0x4e4   : > { %3087 = shalt.err (!%p3084_p3)
}
 0x4e5   : > { %s3088_s22 = scalar_lea.hbm %s3651_s3, 1024  ;;  %s3092_s21 = scalar_lea.hbm %s3705_s11, 4096 }
 0x4e6   : > { %p3089_p5 = scmp.ne.s32.totalorder %s3651_s3, %s3088_s22  ;;  %p3093_p8 = scmp.lt.s32.totalorder %s3651_s3, %s3705_s11 }
 0x4e7   : > { %p3094_p9 = scmp.lt.s32.totalorder %s3092_s21, %s3088_s22 }
 0x4e8   : > { %p3090_p4 = pnand %p3089_p5, %p3746_p13 }
 0x4e9   : > { %p3095_p11 = por %p3094_p9, %p3093_p8 }
 0x4ea   : > { %p3091_p7 = pneg %p3090_p4 }
 0x4ec   : > { %p3096_p12 = pnand %p3095_p11, %p3091_p7 }
 0x4ee   : > { %3099 = shalt.err (!%p3096_p12)
}
 0x4ef   : > { %s3167_s7 = smov 128   ;;  %s3168_s28 = smov 8  }
 0x4f0   : > { %2632 = dma.vmem_to_hbm [thread:$0]  (%p3746_p13), %s3644_s5, 1024, %s3651_s3, %s2136_s1, %s3167_s7, %s3167_s7, %s3168_s28  }
 0x4f1 PF: > { %p2674_p0 = scmp.ge.s32.totalorder %s3150_s20, 2  ;;  %s2164_s4 = sand.u32 1, %s3138_s17  }
 0x4f2   : > { %p3747_p2 = scmp.ne.s32.totalorder %s3734_s16, 0  ;;  %s2165_s23 = scalar_lea.sflag [#allocation4], %s2164_s4 }
 0x4f4   : > { %p2658_p6 = pnand %p2674_p0, %p3747_p2 }
 0x4f6   : > { %p2659_p10 = pneg %p2658_p6 }
 0x4f8   : > { %3133 = dma.done.wait (%p2659_p10), %s2165_s23, 1024  }
 0x4f9   : > { %3135 = vsyncadd (%p2659_p10), %s2165_s23, 4294966272  ;;  %p27_p1 = scmp.ge.s32.totalorder %s3336_s30, 6   ;;  %s3748_s17 = smov %s3142_s18 }
 0x4fa   : > { %s3749_s18 = smov %s3146_s19  ;;  %s3750_s19 = smov %s3347_s12 }
 0x4fb   : > { %s3751_s20 = smov %s3336_s30  ;;  %29 = sbr.rel (!%p27_p1) target bundleno = 14 (0xe), region = 133 }
 0x500   :  { %2170 = vsyncpa [#allocation3], 1 }
 0x501   :  { %2172 = vsyncpa [#allocation3 + $0x1], 1 }
 0x502   :  { %2173 = vsyncpa [#allocation6], 1 }
 0x503   :  { %2174 = vsyncpa [#allocation9], 1 }
 0x504   :  { %2175 = vsyncpa [#allocation12], 1 }
 0x505   :  { %2176 = vsyncpa [#allocation4], 1 }
 0x506   :  { %2178 = vsyncpa [#allocation4 + $0x1], 1 }

</bundles_post_ra>
